<compile_context>
chip_gen: v6e
topology: v6e:2x2x1
jax: 0.10.0
libtpu: 0.0.40
codegen_flags: <defaults>
</compile_context>

<pallas_src>
import jax
import jax.numpy as jnp
from jax.experimental import pallas as pl
from jax.experimental.pallas import tpu as pltpu


TM = 512  # batch tile (multiple of 128 -> full MXU M passes; sweep 256/512/1024)


def _round_up(x, m):
    return ((x + m - 1) // m) * m


def mlp_kernel(x_ref, w1_ref, b1_ref, w2_ref, b2_ref, w3_ref, b3_ref, o_ref):
    x = x_ref[...]                                                      # (TM, 15)

    # layer_1 + ReLU   (BN1 is folded into w2/b2)
    h = jnp.dot(x, w1_ref[...], preferred_element_type=jnp.float32) + b1_ref[...]
    h = jnp.maximum(h, 0.0)

    # layer_2 (BN1-folded) + ReLU   (BN2 is folded into w3/b3)
    h = jnp.dot(h, w2_ref[...], preferred_element_type=jnp.float32) + b2_ref[...]
    h = jnp.maximum(h, 0.0)

    # dropout: identity in eval mode.

    # layer_out (BN2-folded): 1-wide output -> VPU multiply + lane reduction
    # instead of an almost-empty MXU matmul.
    o_ref[...] = jnp.sum(h * w3_ref[...], axis=-1, keepdims=True) + b3_ref[...]


def binary_classification_forward(x, folded_params, tm=TM):
    (w1, b1, w2, b2, w3_row, b3) = folded_params
    n = x.shape[0]
    tm = min(tm, _round_up(n, 8))          # keep tile sane for tiny batches
    grid = (pl.cdiv(n, tm),)

    def full_spec(shape):
        # Whole (small) parameter array resident per grid step.
        return pl.BlockSpec(shape, lambda i: tuple(0 for _ in shape))

    return pl.pallas_call(
        mlp_kernel,
        out_shape=jax.ShapeDtypeStruct((n, 1), jnp.float32),
        grid_spec=pltpu.PrefetchScalarGridSpec(
            num_scalar_prefetch=0,
            grid=grid,
            in_specs=[
                pl.BlockSpec((tm, 15), lambda i: (i, 0)),   # x tile
                full_spec(w1.shape), full_spec(b1.shape),
                full_spec(w2.shape), full_spec(b2.shape),
                full_spec(w3_row.shape), full_spec(b3.shape),
            ],
            out_specs=pl.BlockSpec((tm, 1), lambda i: (i, 0)),
        ),
        compiler_params=pltpu.CompilerParams(
            dimension_semantics=("parallel",)),
    )(x, w1, b1, w2, b2, w3_row, b3)


def init_raw_params(key):
    """Deterministic init mirroring PyTorch nn.Linear / nn.BatchNorm1d defaults."""
    def linear(key, fan_in, fan_out):
        kw, kb = jax.random.split(key)
        bound = 1.0 / jnp.sqrt(fan_in)
        # stored transposed: (in, out)
        w_t = jax.random.uniform(kw, (fan_in, fan_out), jnp.float32, -bound, bound)
        b = jax.random.uniform(kb, (1, fan_out), jnp.float32, -bound, bound)
        return w_t, b

    k1, k2, k3 = jax.random.split(key, 3)
    w1, b1 = linear(k1, 15, 64)
    w2, b2 = linear(k2, 64, 64)
    w3, b3 = linear(k3, 64, 1)

    eps = 1e-5
    # BatchNorm1d(64) defaults: gamma=1, beta=0, running_mean=0, running_var=1
    gamma = jnp.ones((1, 64), jnp.float32)
    beta = jnp.zeros((1, 64), jnp.float32)
    rmean = jnp.zeros((1, 64), jnp.float32)
    rvar = jnp.ones((1, 64), jnp.float32)

    s1 = gamma / jnp.sqrt(rvar + eps)
    t1 = beta - rmean * s1
    s2 = gamma / jnp.sqrt(rvar + eps)
    t2 = beta - rmean * s2

    return (w1, b1, s1, t1, w2, b2, s2, t2, w3, b3)


def fold_params(raw):
    """Fold the eval-mode BN scale/shift into the following Linear layer.

    (h*s1 + t1) @ W2 + b2 == h @ (s1^T * W2) + (t1 @ W2 + b2), etc.
    """
    (w1, b1, s1, t1, w2, b2, s2, t2, w3, b3) = raw
    w2f = s1.reshape(-1, 1) * w2                 # (64, 64)
    b2f = b2 + t1 @ w2                           # (1, 64)
    w3f = s2.reshape(-1, 1) * w3                 # (64, 1)
    b3f = b3 + t2 @ w3                           # (1, 1)
    w3_row = w3f.reshape(1, -1)                  # (1, 64) row for VPU reduce
    return (w1, b1, w2f, b2f, w3_row, b3f)


def reference_forward(x, raw):
    """Pure-JAX eval-mode reference using the UNFOLDED parameters."""
    (w1, b1, s1, t1, w2, b2, s2, t2, w3, b3) = raw
    h = jnp.maximum(x @ w1 + b1, 0.0) * s1 + t1
    h = jnp.maximum(h @ w2 + b2, 0.0) * s2 + t2
    return h @ w3 + b3


if __name__ == "__main__":
    key = jax.random.PRNGKey(0)
    kx, kp = jax.random.split(key)

    # N=1024 with TM=512 -> 2 grid steps (so both TensorCores get work on v7x)
    # while still being a tiny (60 KiB) input.
    N = 1024
    x = jax.random.normal(kx, (N, 15), jnp.float32)

    raw_params = init_raw_params(kp)
    folded = fold_params(raw_params)

    out = binary_classification_forward(x, folded)
    out = jax.block_until_ready(out)

    ref = reference_forward(x, raw_params)
    assert out.shape == (N, 1)
    assert jnp.allclose(out, ref, atol=1e-5, rtol=1e-5), "mismatch vs JAX reference"

    print("KERNEL_OK")
</pallas_src>

<mosaic_0001>
module attributes {stable_mosaic.version = 11 : i64} {
  func.func @mlp_kernel(%arg0: i32, %arg1: memref<512x15xf32, #tpu.memory_space<vmem>>, %arg2: memref<15x64xf32, #tpu.memory_space<vmem>>, %arg3: memref<1x64xf32, #tpu.memory_space<vmem>>, %arg4: memref<64x64xf32, #tpu.memory_space<vmem>>, %arg5: memref<1x64xf32, #tpu.memory_space<vmem>>, %arg6: memref<1x64xf32, #tpu.memory_space<vmem>>, %arg7: memref<1x1xf32, #tpu.memory_space<vmem>>, %arg8: memref<512x1xf32, #tpu.memory_space<vmem>>) attributes {dimension_semantics = [#tpu.dimension_semantics<parallel>], iteration_bounds = array<i64: 2>, scalar_prefetch = 0 : i64, scratch_operands = 0 : i64, tpu.core_type = #tpu.core_type<tc>, window_params = [{transform_indices = @transform_0, window_bounds = array<i64: 512, 15>}, {pipeline_mode = #tpu.pipeline_mode<synchronous>, transform_indices = @transform_1, window_bounds = array<i64: 15, 64>}, {pipeline_mode = #tpu.pipeline_mode<synchronous>, transform_indices = @transform_2, window_bounds = array<i64: 1, 64>}, {pipeline_mode = #tpu.pipeline_mode<synchronous>, transform_indices = @transform_3, window_bounds = array<i64: 64, 64>}, {pipeline_mode = #tpu.pipeline_mode<synchronous>, transform_indices = @transform_4, window_bounds = array<i64: 1, 64>}, {pipeline_mode = #tpu.pipeline_mode<synchronous>, transform_indices = @transform_5, window_bounds = array<i64: 1, 64>}, {pipeline_mode = #tpu.pipeline_mode<synchronous>, transform_indices = @transform_6, window_bounds = array<i64: 1, 1>}, {transform_indices = @transform_7, window_bounds = array<i64: 512, 1>}]} {
    %c0 = arith.constant 0 : index
    %c0_0 = arith.constant 0 : index
    %0 = vector.load %arg1[%c0, %c0_0] : memref<512x15xf32, #tpu.memory_space<vmem>>, vector<512x15xf32>
    %c0_1 = arith.constant 0 : index
    %c0_2 = arith.constant 0 : index
    %1 = vector.load %arg2[%c0_1, %c0_2] : memref<15x64xf32, #tpu.memory_space<vmem>>, vector<15x64xf32>
    %cst = arith.constant dense<0.000000e+00> : vector<512x64xf32>
    %2 = tpu.matmul %0, %1, %cst {dimension_numbers = #tpu.dot_dimension_numbers<[1], [0], [0], [1], [0, 0, 1, 1], [], []>} : vector<512x15xf32>, vector<15x64xf32>, vector<512x64xf32> -> vector<512x64xf32>
    %c0_3 = arith.constant 0 : index
    %c0_4 = arith.constant 0 : index
    %3 = vector.load %arg3[%c0_3, %c0_4] : memref<1x64xf32, #tpu.memory_space<vmem>>, vector<1x64xf32>
    %4 = vector.broadcast %3 : vector<1x64xf32> to vector<512x64xf32>
    %5 = arith.addf %2, %4 : vector<512x64xf32>
    %cst_5 = arith.constant 0.000000e+00 : f32
    %6 = vector.broadcast %cst_5 : f32 to vector<512x64xf32>
    %7 = arith.maximumf %5, %6 : vector<512x64xf32>
    %c0_6 = arith.constant 0 : index
    %c0_7 = arith.constant 0 : index
    %8 = vector.load %arg4[%c0_6, %c0_7] : memref<64x64xf32, #tpu.memory_space<vmem>>, vector<64x64xf32>
    %cst_8 = arith.constant dense<0.000000e+00> : vector<512x64xf32>
    %9 = tpu.matmul %7, %8, %cst_8 {dimension_numbers = #tpu.dot_dimension_numbers<[1], [0], [0], [1], [0, 0, 1, 1], [], []>} : vector<512x64xf32>, vector<64x64xf32>, vector<512x64xf32> -> vector<512x64xf32>
    %c0_9 = arith.constant 0 : index
    %c0_10 = arith.constant 0 : index
    %10 = vector.load %arg5[%c0_9, %c0_10] : memref<1x64xf32, #tpu.memory_space<vmem>>, vector<1x64xf32>
    %11 = vector.broadcast %10 : vector<1x64xf32> to vector<512x64xf32>
    %12 = arith.addf %9, %11 : vector<512x64xf32>
    %cst_11 = arith.constant 0.000000e+00 : f32
    %13 = vector.broadcast %cst_11 : f32 to vector<512x64xf32>
    %14 = arith.maximumf %12, %13 : vector<512x64xf32>
    %c0_12 = arith.constant 0 : index
    %c0_13 = arith.constant 0 : index
    %15 = vector.load %arg6[%c0_12, %c0_13] : memref<1x64xf32, #tpu.memory_space<vmem>>, vector<1x64xf32>
    %16 = vector.broadcast %15 : vector<1x64xf32> to vector<512x64xf32>
    %17 = arith.mulf %14, %16 : vector<512x64xf32>
    %cst_14 = arith.constant dense<0.000000e+00> : vector<512xf32>
    %18 = vector.multi_reduction <add>, %17, %cst_14 [1] : vector<512x64xf32> to vector<512xf32>
    %19 = vector.shape_cast %18 : vector<512xf32> to vector<512x1xf32>
    %c0_15 = arith.constant 0 : index
    %c0_16 = arith.constant 0 : index
    %20 = vector.load %arg7[%c0_15, %c0_16] : memref<1x1xf32, #tpu.memory_space<vmem>>, vector<1x1xf32>
    %21 = vector.broadcast %20 : vector<1x1xf32> to vector<512x1xf32>
    %22 = arith.addf %19, %21 : vector<512x1xf32>
    %c0_17 = arith.constant 0 : index
    %c0_18 = arith.constant 0 : index
    %23 = vector.load %arg8[%c0_17, %c0_18] : memref<512x1xf32, #tpu.memory_space<vmem>>, vector<512x1xf32>
    tpu.vector_store %arg8[%c0_17, %c0_18], %22 {strides = array<i32>} : memref<512x1xf32, #tpu.memory_space<vmem>>, vector<512x1xf32>,
    return
  }
  func.func @transform_0(%arg0: i32) -> (i32, i32) {
    %c0_i32 = arith.constant 0 : i32
    %c0_i32_0 = arith.constant 0 : i32
    return %arg0, %c0_i32 : i32, i32
  }
  func.func @transform_1(%arg0: i32) -> (i32, i32) {
    %c0_i32 = arith.constant 0 : i32
    %c0_i32_0 = arith.constant 0 : i32
    %c0_i32_1 = arith.constant 0 : i32
    return %c0_i32, %c0_i32_0 : i32, i32
  }
  func.func @transform_2(%arg0: i32) -> (i32, i32) {
    %c0_i32 = arith.constant 0 : i32
    %c0_i32_0 = arith.constant 0 : i32
    %c0_i32_1 = arith.constant 0 : i32
    return %c0_i32, %c0_i32_0 : i32, i32
  }
  func.func @transform_3(%arg0: i32) -> (i32, i32) {
    %c0_i32 = arith.constant 0 : i32
    %c0_i32_0 = arith.constant 0 : i32
    %c0_i32_1 = arith.constant 0 : i32
    return %c0_i32, %c0_i32_0 : i32, i32
  }
  func.func @transform_4(%arg0: i32) -> (i32, i32) {
    %c0_i32 = arith.constant 0 : i32
    %c0_i32_0 = arith.constant 0 : i32
    %c0_i32_1 = arith.constant 0 : i32
    return %c0_i32, %c0_i32_0 : i32, i32
  }
  func.func @transform_5(%arg0: i32) -> (i32, i32) {
    %c0_i32 = arith.constant 0 : i32
    %c0_i32_0 = arith.constant 0 : i32
    %c0_i32_1 = arith.constant 0 : i32
    return %c0_i32, %c0_i32_0 : i32, i32
  }
  func.func @transform_6(%arg0: i32) -> (i32, i32) {
    %c0_i32 = arith.constant 0 : i32
    %c0_i32_0 = arith.constant 0 : i32
    %c0_i32_1 = arith.constant 0 : i32
    return %c0_i32, %c0_i32_0 : i32, i32
  }
  func.func @transform_7(%arg0: i32) -> (i32, i32) {
    %c0_i32 = arith.constant 0 : i32
    %c0_i32_0 = arith.constant 0 : i32
    return %arg0, %c0_i32 : i32, i32
  }
}

</mosaic_0001>

<bundles_post_ra>
// kernel: tpu_custom_call.1
= control target key start
LH: loop header
LB: loop body
LE: loop exit
PB: predicated region body
PF: predicated region fallthrough
CT: control target
= control target key end

     0   :  { %s2684_s26 = smov 0   ;;  %s3399_s0 = inlined_call_operand.vmem [shape: f32[1024,15], index: 0, kind: input, shape index: {}]   ;;  %s3400_s1 = inlined_call_operand.vmem [shape: f32[15,64], index: 1, kind: input, shape index: {}]   ;;  %s3401_s2 = inlined_call_operand.vmem [shape: f32[1,64], index: 2, kind: input, shape index: {}]   ;;  %s3402_s3 = inlined_call_operand.vmem [shape: f32[64,64], index: 3, kind: input, shape index: {}]   ;;  %s3403_s4 = inlined_call_operand.vmem [shape: f32[1,64], index: 4, kind: input, shape index: {}]   ;;  %s3404_s5 = inlined_call_operand.vmem [shape: f32[1,64], index: 5, kind: input, shape index: {}]   ;;  %s3405_s6 = inlined_call_operand.<no memory space> [shape: f32[1,1], index: 6, kind: input, shape index: {}]   ;;  %s3406_s7 = inlined_call_operand.vmem [shape: f32[1024,1], index: 7, kind: output, shape index: {}]  }
   0x1   :  { %v12_v0 = vstv %s3405_s6 }
   0x2   :  { %13 = vst [vmem:[#allocation2] sm:$0x1] %v12_v0 }
   0x3 LB: > { %s2115_s27 = sadd.s32 4294967295, %s2639_s26   ;;  %p2119_p0 = scmp.ge.s32.totalorder %s2639_s26, 1  ;;  %s2639_s26 = sphi %s2684_s26, %s19_s26  }
   0x4   : > { %p240_p1 = scmp.lt.s32.totalorder %s2639_s26, 3 }
   0x6   : > { %p241_p2 = pnand %p2119_p0, %p240_p1 }
   0x7   : > { %s2120_s8 = sshll.u32 (!%p241_p2), %s2115_s27, 6 }
   0x8   : > { %244 = sbr.rel (%p241_p2) target bundleno = 690 (0x2b2), region = 48  ;;  %p273_p3 = scmp.lt.s32.totalorder (!%p241_p2), %s2120_s8, 127 }
   0xd   : > { %v349_v1 = vld [vmem:[%s3400_s1 + $0x8] sm:$0x7f]  ;;  %vm550_vm0 = vcmask 1046528   ;;  %v348_v2 = vld [vmem:[%s3400_s1] sm:$0xff]  ;;  %v1010_v3 = vld [vmem:[%s3402_s3 + $0x38] sm:$0xff]  ;;  %s3408_s8 = smov (!%p273_p3, %s2120_s8), 127 }
   0xe   : > { %2397 = vmatprep.subr.msk.mxu0 %vm550_vm0, %v349_v1  ;;  %2609 = vmatprep.subr.mxu1 %v1010_v3  ;;  %v1009_v4 = vld [vmem:[%s3402_s3 + $0x30] sm:$0xff]  ;;  %s2121_s13 = sshll.u32 %s3408_s8, 3  ;;  %vm357_vm1 = vcmask 121856   ;;  %v1008_v5 = vld [vmem:[%s3402_s3 + $0x28] sm:$0xff]  ;;  %v1007_v6 = vld [vmem:[%s3402_s3 + $0x20] sm:$0xff]  ;;  %vm1018_vm2 = vcmask 523264  }
   0xf   : > { %2398 = vmatpush3.msk.msra.mxu0 %vm550_vm0, %v349_v1  ;;  %2617 = vmatpush3.msra.mxu1 %v1010_v3  ;;  %s2715_s18 = scalar_lea.vmem %s3399_s0, %s2121_s13  ;;  %v1006_v11 = vld [vmem:[%s3402_s3 + $0x18] sm:$0xff]  ;;  %v1005_v14 = vld [vmem:[%s3402_s3 + $0x10] sm:$0xff]  ;;  %v1004_v17 = vld [vmem:[%s3402_s3 + $0x8] sm:$0xff]  ;;  %s3202_s16 = scalar_lea.vmem %s3406_s7, %s2121_s13  ;;  %vm1994_vm3 = vcmask 7168  }
  0x10   : > { %2399 = vmatprep.subr.mxu0 %v348_v2  ;;  %2610 = vmatprep.subr.mxu1 %v1009_v4  ;;  %v284_v7 = vld [vmem:[%s2715_s18] sm:$0xff]  ;;  %v285_v8 = vld [vmem:[%s2715_s18 + $0x8] sm:$0xff]  ;;  %v286_v9 = vld [vmem:[%s2715_s18 + $0x10] sm:$0xff] }
  0x11   : > { %2400 = vmatpush3.msra.mxu0 %v348_v2  ;;  %2618 = vmatpush3.msra.mxu1 %v1009_v4  ;;  %v287_v10 = vld [vmem:[%s2715_s18 + $0x18] sm:$0xff]  ;;  %v288_v12 = vld [vmem:[%s2715_s18 + $0x20] sm:$0xff]  ;;  %v289_v13 = vld [vmem:[%s2715_s18 + $0x28] sm:$0xff] }
  0x12   : > { %2497 = vmatprep.subr.mxu0 %v1010_v3  ;;  %2611 = vmatprep.subr.mxu1 %v1008_v5  ;;  %v290_v15 = vld [vmem:[%s2715_s18 + $0x30] sm:$0xff]  ;;  %v291_v16 = vld [vmem:[%s2715_s18 + $0x38] sm:$0xff]  ;;  %v292_v18 = vld [vmem:[%s2715_s18 + $0x40] sm:$0xff] }
  0x13   : > { %2619 = vmatpush3.msra.mxu1 %v1008_v5  ;;  %2401 = vmatprep.mubr.msk.f32.mxu0 %vm357_vm1, %v284_v7  ;;  %v1003_v19 = vld [vmem:[%s3402_s3] sm:$0xff]  ;;  %v293_v20 = vld [vmem:[%s2715_s18 + $0x48] sm:$0xff]  ;;  %v294_v21 = vld [vmem:[%s2715_s18 + $0x50] sm:$0xff] }
  0x14   : > { %2612 = vmatprep.subr.mxu1 %v1007_v6  ;;  %2402 = vmatmul.mubr.msk.f32.vlgmr.msra.gmra.mxu0 %vm357_vm1, %v285_v8  ;;  %v295_v22 = vld [vmem:[%s2715_s18 + $0x58] sm:$0xff]  ;;  %v296_v23 = vld [vmem:[%s2715_s18 + $0x60] sm:$0xff]  ;;  %v297_v24 = vld [vmem:[%s2715_s18 + $0x68] sm:$0xff] }
  0x15   : > { %2620 = vmatpush3.msra.mxu1 %v1007_v6  ;;  %2404 = vmatprep.mubr.msk.f32.mxu0 %vm357_vm1, %v286_v9  ;;  %v298_v25 = vld [vmem:[%s2715_s18 + $0x70] sm:$0xff]  ;;  %v299_v26 = vld [vmem:[%s2715_s18 + $0x78] sm:$0xff]  ;;  %v300_v27 = vld [vmem:[%s2715_s18 + $0x80] sm:$0xff] }
  0x16   : > { %2498 = vmatpush3.msra.mxu0 %v1010_v3  ;;  %2613 = vmatprep.subr.mxu1 %v1006_v11  ;;  %v301_v28 = vld [vmem:[%s2715_s18 + $0x88] sm:$0xff]  ;;  %v302_v29 = vld [vmem:[%s2715_s18 + $0x90] sm:$0xff]  ;;  %v303_v30 = vld [vmem:[%s2715_s18 + $0x98] sm:$0xff] }
  0x17   : > { %2499 = vmatprep.subr.mxu0 %v1009_v4  ;;  %2621 = vmatpush3.msra.mxu1 %v1006_v11  ;;  %v304_v31 = vld [vmem:[%s2715_s18 + $0xa0] sm:$0xff]  ;;  %v305_v32 = vld [vmem:[%s2715_s18 + $0xa8] sm:$0xff]  ;;  %v306_v33 = vld [vmem:[%s2715_s18 + $0xb0] sm:$0xff] }
  0x18   : > { %2500 = vmatpush3.msra.mxu0 %v1009_v4  ;;  %2614 = vmatprep.subr.mxu1 %v1005_v14  ;;  %v307_v34 = vld [vmem:[%s2715_s18 + $0xb8] sm:$0xff]  ;;  %v308_v35 = vld [vmem:[%s2715_s18 + $0xc0] sm:$0xff]  ;;  %v309_v36 = vld [vmem:[%s2715_s18 + $0xc8] sm:$0xff] }
  0x19   : > { %2405 = vmatmul.mubr.msk.f32.gmra.mxu0 %vm357_vm1, %v287_v10  ;;  %2501 = vmatprep.subr.mxu0 %v1008_v5  ;;  %v310_v37 = vld [vmem:[%s2715_s18 + $0xd0] sm:$0xff]  ;;  %v311_v38 = vld [vmem:[%s2715_s18 + $0xd8] sm:$0xff]  ;;  %v312_v39 = vld [vmem:[%s2715_s18 + $0xe0] sm:$0xff] }
  0x1a   : > { %2407 = vmatprep.mubr.msk.f32.mxu0 %vm357_vm1, %v288_v12  ;;  %2502 = vmatpush3.msra.mxu0 %v1008_v5  ;;  %v313_v40 = vld [vmem:[%s2715_s18 + $0xe8] sm:$0xff]  ;;  %v314_v41 = vld [vmem:[%s2715_s18 + $0xf0] sm:$0xff]  ;;  %v315_v42 = vld [vmem:[%s2715_s18 + $0xf8] sm:$0xff] }
  0x1b   : > { %2503 = vmatprep.subr.mxu0 %v1007_v6  ;;  %2622 = vmatpush3.msra.mxu1 %v1005_v14  ;;  %v316_v43 = vld [vmem:[%s2715_s18 + $0x100] sm:$0xff]  ;;  %v317_v44 = vld [vmem:[%s2715_s18 + $0x108] sm:$0xff]  ;;  %v318_v45 = vld [vmem:[%s2715_s18 + $0x110] sm:$0xff] }
  0x1c   : > { %2504 = vmatpush3.msra.mxu0 %v1007_v6  ;;  %2615 = vmatprep.subr.mxu1 %v1004_v17  ;;  %v319_v46 = vld [vmem:[%s2715_s18 + $0x118] sm:$0xff]  ;;  %v320_v47 = vld [vmem:[%s2715_s18 + $0x120] sm:$0xff]  ;;  %v321_v48 = vld [vmem:[%s2715_s18 + $0x128] sm:$0xff] }
  0x1d   : > { %2408 = vmatmul.mubr.msk.f32.gmra.mxu0 %vm357_vm1, %v289_v13  ;;  %2505 = vmatprep.subr.mxu0 %v1006_v11  ;;  %v322_v49 = vld [vmem:[%s2715_s18 + $0x130] sm:$0xff]  ;;  %v323_v50 = vld [vmem:[%s2715_s18 + $0x138] sm:$0xff]  ;;  %v324_v51 = vld [vmem:[%s2715_s18 + $0x140] sm:$0xff] }
  0x1e   : > { %2410 = vmatprep.mubr.msk.f32.mxu0 %vm357_vm1, %v290_v15  ;;  %2506 = vmatpush3.msra.mxu0 %v1006_v11  ;;  %v325_v52 = vld [vmem:[%s2715_s18 + $0x148] sm:$0xff]  ;;  %v326_v53 = vld [vmem:[%s2715_s18 + $0x150] sm:$0xff]  ;;  %v327_v54 = vld [vmem:[%s2715_s18 + $0x158] sm:$0xff] }
  0x1f   : > { %2507 = vmatprep.subr.mxu0 %v1005_v14  ;;  %2623 = vmatpush3.msra.mxu1 %v1004_v17  ;;  %v328_v55 = vld [vmem:[%s2715_s18 + $0x160] sm:$0xff]  ;;  %v329_v56 = vld [vmem:[%s2715_s18 + $0x168] sm:$0xff]  ;;  %v330_v57 = vld [vmem:[%s2715_s18 + $0x170] sm:$0xff] }
  0x20   : > { %2508 = vmatpush3.msra.mxu0 %v1005_v14  ;;  %2616 = vmatprep.subr.mxu1 %v1003_v19  ;;  %v331_v58 = vld [vmem:[%s2715_s18 + $0x178] sm:$0xff]  ;;  %v332_v59 = vld [vmem:[%s2715_s18 + $0x180] sm:$0xff]  ;;  %v333_v60 = vld [vmem:[%s2715_s18 + $0x188] sm:$0xff] }
  0x21   : > { %2411 = vmatmul.mubr.msk.f32.gmra.mxu0 %vm357_vm1, %v291_v16  ;;  %2509 = vmatprep.subr.mxu0 %v1004_v17  ;;  %v334_v61 = vld [vmem:[%s2715_s18 + $0x190] sm:$0xff]  ;;  %v335_v62 = vld [vmem:[%s2715_s18 + $0x198] sm:$0xff]  ;;  %v336_v63 = vld [vmem:[%s2715_s18 + $0x1a0] sm:$0xff] }
  0x22   : > { %2413 = vmatprep.mubr.msk.f32.mxu0 %vm357_vm1, %v292_v18  ;;  %2510 = vmatpush3.msra.mxu0 %v1004_v17  ;;  %v337_v0 = vld [vmem:[%s2715_s18 + $0x1a8] sm:$0xff]  ;;  %v338_v1 = vld [vmem:[%s2715_s18 + $0x1b0] sm:$0xff]  ;;  %v339_v2 = vld [vmem:[%s2715_s18 + $0x1b8] sm:$0xff] }
  0x23   : > { %2511 = vmatprep.subr.mxu0 %v1003_v19  ;;  %2624 = vmatpush3.msra.mxu1 %v1003_v19  ;;  %v340_v3 = vld [vmem:[%s2715_s18 + $0x1c0] sm:$0xff]  ;;  %v341_v4 = vld [vmem:[%s2715_s18 + $0x1c8] sm:$0xff]  ;;  %v342_v5 = vld [vmem:[%s2715_s18 + $0x1d0] sm:$0xff] }
  0x24   : > { %2512 = vmatpush3.msra.mxu0 %v1003_v19  ;;  %v343_v6 = vld [vmem:[%s2715_s18 + $0x1d8] sm:$0xff]  ;;  %v344_v7 = vld [vmem:[%s2715_s18 + $0x1e0] sm:$0xff]  ;;  %v345_v8 = vld [vmem:[%s2715_s18 + $0x1e8] sm:$0xff] }
  0x25   : > { %2414 = vmatmul.mubr.msk.f32.gmra.mxu0 %vm357_vm1, %v293_v20  ;;  %v346_v9 = vld [vmem:[%s2715_s18 + $0x1f0] sm:$0xff]  ;;  %v347_v10 = vld [vmem:[%s2715_s18 + $0x1f8] sm:$0xff]  ;;  %v2863_v11 = vld [vmem:[%s3401_s2] ss:$0 sm:$0xff] }
  0x26   : > { %2416 = vmatprep.mubr.msk.f32.mxu0 %vm357_vm1, %v294_v21 }
  0x29   : > { %2417 = vmatmul.mubr.msk.f32.gmra.mxu0 %vm357_vm1, %v295_v22 }
  0x2a   : > { %2419 = vmatprep.mubr.msk.f32.mxu0 %vm357_vm1, %v296_v23 }
  0x2d   : > { %2420 = vmatmul.mubr.msk.f32.gmra.mxu0 %vm357_vm1, %v297_v24 }
  0x2e   : > { %2422 = vmatprep.mubr.msk.f32.mxu0 %vm357_vm1, %v298_v25 }
  0x31   : > { %2423 = vmatmul.mubr.msk.f32.gmra.mxu0 %vm357_vm1, %v299_v26 }
  0x32   : > { %2425 = vmatprep.mubr.msk.f32.mxu0 %vm357_vm1, %v300_v27 }
  0x35   : > { %2426 = vmatmul.mubr.msk.f32.gmra.mxu0 %vm357_vm1, %v301_v28 }
  0x36   : > { %2428 = vmatprep.mubr.msk.f32.mxu0 %vm357_vm1, %v302_v29 }
  0x39   : > { %2429 = vmatmul.mubr.msk.f32.gmra.mxu0 %vm357_vm1, %v303_v30 }
  0x3a   : > { %2431 = vmatprep.mubr.msk.f32.mxu0 %vm357_vm1, %v304_v31 }
  0x3d   : > { %2432 = vmatmul.mubr.msk.f32.gmra.mxu0 %vm357_vm1, %v305_v32 }
  0x3e   : > { %2434 = vmatprep.mubr.msk.f32.mxu0 %vm357_vm1, %v306_v33 }
  0x41   : > { %2435 = vmatmul.mubr.msk.f32.gmra.mxu0 %vm357_vm1, %v307_v34 }
  0x42   : > { %2437 = vmatprep.mubr.msk.f32.mxu0 %vm357_vm1, %v308_v35 }
  0x45   : > { %2438 = vmatmul.mubr.msk.f32.gmra.mxu0 %vm357_vm1, %v309_v36 }
  0x46   : > { %2440 = vmatprep.mubr.msk.f32.mxu0 %vm357_vm1, %v310_v37 }
  0x49   : > { %2441 = vmatmul.mubr.msk.f32.gmra.mxu0 %vm357_vm1, %v311_v38 }
  0x4a   : > { %2443 = vmatprep.mubr.msk.f32.mxu0 %vm357_vm1, %v312_v39 }
  0x4d   : > { %2444 = vmatmul.mubr.msk.f32.gmra.mxu0 %vm357_vm1, %v313_v40 }
  0x4e   : > { %2446 = vmatprep.mubr.msk.f32.mxu0 %vm357_vm1, %v314_v41 }
  0x51   : > { %2447 = vmatmul.mubr.msk.f32.gmra.mxu0 %vm357_vm1, %v315_v42 }
  0x52   : > { %2449 = vmatprep.mubr.msk.f32.mxu0 %vm357_vm1, %v316_v43 }
  0x55   : > { %2450 = vmatmul.mubr.msk.f32.gmra.mxu0 %vm357_vm1, %v317_v44 }
  0x56   : > { %2452 = vmatprep.mubr.msk.f32.mxu0 %vm357_vm1, %v318_v45 }
  0x59   : > { %2453 = vmatmul.mubr.msk.f32.gmra.mxu0 %vm357_vm1, %v319_v46 }
  0x5a   : > { %2455 = vmatprep.mubr.msk.f32.mxu0 %vm357_vm1, %v320_v47 }
  0x5d   : > { %2456 = vmatmul.mubr.msk.f32.gmra.mxu0 %vm357_vm1, %v321_v48 }
  0x5e   : > { %2458 = vmatprep.mubr.msk.f32.mxu0 %vm357_vm1, %v322_v49 }
  0x61   : > { %2459 = vmatmul.mubr.msk.f32.gmra.mxu0 %vm357_vm1, %v323_v50 }
  0x62   : > { %2461 = vmatprep.mubr.msk.f32.mxu0 %vm357_vm1, %v324_v51 }
  0x65   : > { %2462 = vmatmul.mubr.msk.f32.gmra.mxu0 %vm357_vm1, %v325_v52 }
  0x66   : > { %2464 = vmatprep.mubr.msk.f32.mxu0 %vm357_vm1, %v326_v53 }
  0x69   : > { %2465 = vmatmul.mubr.msk.f32.gmra.mxu0 %vm357_vm1, %v327_v54 }
  0x6a   : > { %2467 = vmatprep.mubr.msk.f32.mxu0 %vm357_vm1, %v328_v55 }
  0x6d   : > { %2468 = vmatmul.mubr.msk.f32.gmra.mxu0 %vm357_vm1, %v329_v56 }
  0x6e   : > { %2470 = vmatprep.mubr.msk.f32.mxu0 %vm357_vm1, %v330_v57 }
  0x71   : > { %2471 = vmatmul.mubr.msk.f32.gmra.mxu0 %vm357_vm1, %v331_v58 }
  0x72   : > { %2473 = vmatprep.mubr.msk.f32.mxu0 %vm357_vm1, %v332_v59 }
  0x75   : > { %2474 = vmatmul.mubr.msk.f32.gmra.mxu0 %vm357_vm1, %v333_v60 }
  0x76   : > { %2476 = vmatprep.mubr.msk.f32.mxu0 %vm357_vm1, %v334_v61 }
  0x79   : > { %2477 = vmatmul.mubr.msk.f32.gmra.mxu0 %vm357_vm1, %v335_v62 }
  0x7a   : > { %2479 = vmatprep.mubr.msk.f32.mxu0 %vm357_vm1, %v336_v63 }
  0x7d   : > { %2480 = vmatmul.mubr.msk.f32.gmra.mxu0 %vm357_vm1, %v337_v0 }
  0x7e   : > { %2482 = vmatprep.mubr.msk.f32.mxu0 %vm357_vm1, %v338_v1 }
  0x81   : > { %2483 = vmatmul.mubr.msk.f32.gmra.mxu0 %vm357_vm1, %v339_v2 }
  0x82   : > { %2485 = vmatprep.mubr.msk.f32.mxu0 %vm357_vm1, %v340_v3 }
  0x85   : > { %2486 = vmatmul.mubr.msk.f32.gmra.mxu0 %vm357_vm1, %v341_v4 }
  0x86   : > { %2488 = vmatprep.mubr.msk.f32.mxu0 %vm357_vm1, %v342_v5 }
  0x89   : > { %2489 = vmatmul.mubr.msk.f32.gmra.mxu0 %vm357_vm1, %v343_v6 }
  0x8a   : > { %2491 = vmatprep.mubr.msk.f32.mxu0 %vm357_vm1, %v344_v7 }
  0x8d   : > { %2492 = vmatmul.mubr.msk.f32.gmra.mxu0 %vm357_vm1, %v345_v8 }
  0x8e   : > { %2494 = vmatprep.mubr.msk.f32.mxu0 %vm357_vm1, %v346_v9 }
  0x91   : > { %2495 = vmatmul.mubr.msk.f32.gmra.mxu0 %vm357_vm1, %v347_v10 }
  0xd4   : > { %v2403_v12 = vpop.f32.mrf.mxu0 }
  0xd5   : > { %v626_v13 = vadd.f32 %v2403_v12, %v2863_v11 }
  0xd6   : > { %v620_v14 = vpop.f32.mrf.mxu0 }
  0xd7   : > { %v621_v15 = vadd.f32 %v2863_v11, %v620_v14  ;;  %v940_v18 = vmax.f32 %v626_v13, 0.0 }
  0xd9   : > { %v2406_v16 = vpop.f32.mrf.mxu0  ;;  %v939_v17 = vmax.f32 %v621_v15, 0.0 }
  0xda   : > { %v636_v19 = vadd.f32 %v2406_v16, %v2863_v11 }
  0xdb   : > { %v630_v20 = vpop.f32.mrf.mxu0  ;;  %2513 = vmatprep.mubr.msk.f32.mxu0 %vm1018_vm2, %v939_v17 }
  0xdc   : > { %v631_v21 = vadd.f32 %v2863_v11, %v630_v20  ;;  %2514 = vmatmul.mubr.msk.f32.vlgmr.msra.gmra.mxu0 %vm1018_vm2, %v940_v18  ;;  %v942_v25 = vmax.f32 %v636_v19, 0.0 }
  0xdd   : > { %v2409_v22 = vpop.f32.mrf.mxu0 }
  0xde   : > { %v941_v23 = vmax.f32 %v631_v21, 0.0  ;;  %v646_v24 = vadd.f32 %v2409_v22, %v2863_v11 }
  0xdf   : > { %v640_v26 = vpop.f32.mrf.mxu0 }
  0xe0   : > { %v641_v27 = vadd.f32 %v2863_v11, %v640_v26  ;;  %2516 = vmatprep.mubr.msk.f32.mxu1 %vm1018_vm2, %v941_v23  ;;  %v944_v28 = vmax.f32 %v646_v24, 0.0 }
  0xe1   : > { %v2412_v29 = vpop.f32.mrf.mxu0  ;;  %2517 = vmatmul.mubr.msk.f32.vlgmr.msra.gmra.mxu1 %vm1018_vm2, %v942_v25 }
  0xe2   : > { %v943_v30 = vmax.f32 %v641_v27, 0.0  ;;  %v656_v31 = vadd.f32 %v2412_v29, %v2863_v11 }
  0xe3   : > { %v650_v32 = vpop.f32.mrf.mxu0 }
  0xe4   : > { %v651_v33 = vadd.f32 %v2863_v11, %v650_v32  ;;  %2519 = vmatprep.mubr.msk.f32.mxu1 %vm1018_vm2, %v943_v30  ;;  %v946_v34 = vmax.f32 %v656_v31, 0.0 }
  0xe5   : > { %v2415_v35 = vpop.f32.mrf.mxu0  ;;  %2520 = vmatmul.mubr.msk.f32.gmra.mxu1 %vm1018_vm2, %v944_v28 }
  0xe6   : > { %v945_v36 = vmax.f32 %v651_v33, 0.0  ;;  %v666_v37 = vadd.f32 %v2415_v35, %v2863_v11 }
  0xe7   : > { %v660_v38 = vpop.f32.mrf.mxu0 }
  0xe8   : > { %v661_v39 = vadd.f32 %v2863_v11, %v660_v38  ;;  %2522 = vmatprep.mubr.msk.f32.mxu1 %vm1018_vm2, %v945_v36  ;;  %v948_v40 = vmax.f32 %v666_v37, 0.0 }
  0xe9   : > { %v2418_v41 = vpop.f32.mrf.mxu0  ;;  %2523 = vmatmul.mubr.msk.f32.gmra.mxu1 %vm1018_vm2, %v946_v34 }
  0xea   : > { %v947_v42 = vmax.f32 %v661_v39, 0.0  ;;  %v676_v43 = vadd.f32 %v2418_v41, %v2863_v11 }
  0xeb   : > { %v670_v44 = vpop.f32.mrf.mxu0 }
  0xec   : > { %v671_v45 = vadd.f32 %v2863_v11, %v670_v44  ;;  %2525 = vmatprep.mubr.msk.f32.mxu1 %vm1018_vm2, %v947_v42  ;;  %v950_v46 = vmax.f32 %v676_v43, 0.0 }
  0xed   : > { %v2421_v47 = vpop.f32.mrf.mxu0  ;;  %2526 = vmatmul.mubr.msk.f32.gmra.mxu1 %vm1018_vm2, %v948_v40 }
  0xee   : > { %v949_v48 = vmax.f32 %v671_v45, 0.0  ;;  %v686_v49 = vadd.f32 %v2421_v47, %v2863_v11 }
  0xef   : > { %v680_v50 = vpop.f32.mrf.mxu0 }
  0xf0   : > { %v681_v51 = vadd.f32 %v2863_v11, %v680_v50  ;;  %2528 = vmatprep.mubr.msk.f32.mxu1 %vm1018_vm2, %v949_v48  ;;  %v952_v52 = vmax.f32 %v686_v49, 0.0 }
  0xf1   : > { %v2424_v53 = vpop.f32.mrf.mxu0  ;;  %2529 = vmatmul.mubr.msk.f32.gmra.mxu1 %vm1018_vm2, %v950_v46 }
  0xf2   : > { %v951_v54 = vmax.f32 %v681_v51, 0.0  ;;  %v696_v55 = vadd.f32 %v2424_v53, %v2863_v11 }
  0xf3   : > { %v690_v56 = vpop.f32.mrf.mxu0 }
  0xf4   : > { %v691_v57 = vadd.f32 %v2863_v11, %v690_v56  ;;  %2531 = vmatprep.mubr.msk.f32.mxu1 %vm1018_vm2, %v951_v54  ;;  %v954_v58 = vmax.f32 %v696_v55, 0.0 }
  0xf5   : > { %v2427_v59 = vpop.f32.mrf.mxu0  ;;  %2532 = vmatmul.mubr.msk.f32.gmra.mxu1 %vm1018_vm2, %v952_v52 }
  0xf6   : > { %v953_v60 = vmax.f32 %v691_v57, 0.0  ;;  %v706_v61 = vadd.f32 %v2427_v59, %v2863_v11 }
  0xf7   : > { %v700_v62 = vpop.f32.mrf.mxu0 }
  0xf8   : > { %v701_v63 = vadd.f32 %v2863_v11, %v700_v62  ;;  %2534 = vmatprep.mubr.msk.f32.mxu1 %vm1018_vm2, %v953_v60  ;;  %v956_v0 = vmax.f32 %v706_v61, 0.0 }
  0xf9   : > { %v2430_v1 = vpop.f32.mrf.mxu0  ;;  %2535 = vmatmul.mubr.msk.f32.gmra.mxu1 %vm1018_vm2, %v954_v58 }
  0xfa   : > { %v955_v2 = vmax.f32 %v701_v63, 0.0  ;;  %v716_v3 = vadd.f32 %v2430_v1, %v2863_v11 }
  0xfb   : > { %v710_v4 = vpop.f32.mrf.mxu0 }
  0xfc   : > { %v711_v5 = vadd.f32 %v2863_v11, %v710_v4  ;;  %2537 = vmatprep.mubr.msk.f32.mxu1 %vm1018_vm2, %v955_v2  ;;  %v958_v6 = vmax.f32 %v716_v3, 0.0 }
  0xfd   : > { %v2433_v7 = vpop.f32.mrf.mxu0  ;;  %2538 = vmatmul.mubr.msk.f32.gmra.mxu1 %vm1018_vm2, %v956_v0 }
  0xfe   : > { %v957_v8 = vmax.f32 %v711_v5, 0.0  ;;  %v726_v9 = vadd.f32 %v2433_v7, %v2863_v11 }
  0xff   : > { %v720_v10 = vpop.f32.mrf.mxu0 }
 0x100   : > { %v721_v12 = vadd.f32 %v2863_v11, %v720_v10  ;;  %2540 = vmatprep.mubr.msk.f32.mxu1 %vm1018_vm2, %v957_v8  ;;  %v960_v13 = vmax.f32 %v726_v9, 0.0 }
 0x101   : > { %v2436_v14 = vpop.f32.mrf.mxu0  ;;  %2541 = vmatmul.mubr.msk.f32.gmra.mxu1 %vm1018_vm2, %v958_v6 }
 0x102   : > { %v959_v15 = vmax.f32 %v721_v12, 0.0  ;;  %v736_v16 = vadd.f32 %v2436_v14, %v2863_v11 }
 0x103   : > { %v730_v17 = vpop.f32.mrf.mxu0 }
 0x104   : > { %v731_v18 = vadd.f32 %v2863_v11, %v730_v17  ;;  %2543 = vmatprep.mubr.msk.f32.mxu1 %vm1018_vm2, %v959_v15  ;;  %v962_v19 = vmax.f32 %v736_v16, 0.0 }
 0x105   : > { %v2439_v20 = vpop.f32.mrf.mxu0  ;;  %2544 = vmatmul.mubr.msk.f32.gmra.mxu1 %vm1018_vm2, %v960_v13 }
 0x106   : > { %v961_v21 = vmax.f32 %v731_v18, 0.0  ;;  %v746_v22 = vadd.f32 %v2439_v20, %v2863_v11 }
 0x107   : > { %v740_v23 = vpop.f32.mrf.mxu0 }
 0x108   : > { %v741_v24 = vadd.f32 %v2863_v11, %v740_v23  ;;  %2546 = vmatprep.mubr.msk.f32.mxu1 %vm1018_vm2, %v961_v21  ;;  %v964_v25 = vmax.f32 %v746_v22, 0.0 }
 0x109   : > { %v2442_v26 = vpop.f32.mrf.mxu0  ;;  %2547 = vmatmul.mubr.msk.f32.gmra.mxu1 %vm1018_vm2, %v962_v19 }
 0x10a   : > { %v963_v27 = vmax.f32 %v741_v24, 0.0  ;;  %v756_v28 = vadd.f32 %v2442_v26, %v2863_v11 }
 0x10b   : > { %v750_v29 = vpop.f32.mrf.mxu0 }
 0x10c   : > { %v751_v30 = vadd.f32 %v2863_v11, %v750_v29  ;;  %2549 = vmatprep.mubr.msk.f32.mxu1 %vm1018_vm2, %v963_v27  ;;  %v966_v31 = vmax.f32 %v756_v28, 0.0 }
 0x10d   : > { %v2445_v32 = vpop.f32.mrf.mxu0  ;;  %2550 = vmatmul.mubr.msk.f32.gmra.mxu1 %vm1018_vm2, %v964_v25 }
 0x10e   : > { %v965_v33 = vmax.f32 %v751_v30, 0.0  ;;  %v766_v34 = vadd.f32 %v2445_v32, %v2863_v11 }
 0x10f   : > { %v760_v35 = vpop.f32.mrf.mxu0 }
 0x110   : > { %v761_v36 = vadd.f32 %v2863_v11, %v760_v35  ;;  %2552 = vmatprep.mubr.msk.f32.mxu1 %vm1018_vm2, %v965_v33  ;;  %v968_v37 = vmax.f32 %v766_v34, 0.0 }
 0x111   : > { %v2448_v38 = vpop.f32.mrf.mxu0  ;;  %2553 = vmatmul.mubr.msk.f32.gmra.mxu1 %vm1018_vm2, %v966_v31 }
 0x112   : > { %v967_v39 = vmax.f32 %v761_v36, 0.0  ;;  %v776_v40 = vadd.f32 %v2448_v38, %v2863_v11 }
 0x113   : > { %v770_v41 = vpop.f32.mrf.mxu0 }
 0x114   : > { %v771_v42 = vadd.f32 %v2863_v11, %v770_v41  ;;  %2555 = vmatprep.mubr.msk.f32.mxu1 %vm1018_vm2, %v967_v39  ;;  %v970_v43 = vmax.f32 %v776_v40, 0.0 }
 0x115   : > { %v2451_v44 = vpop.f32.mrf.mxu0  ;;  %2556 = vmatmul.mubr.msk.f32.gmra.mxu1 %vm1018_vm2, %v968_v37 }
 0x116   : > { %v969_v45 = vmax.f32 %v771_v42, 0.0  ;;  %v786_v46 = vadd.f32 %v2451_v44, %v2863_v11 }
 0x117   : > { %v780_v47 = vpop.f32.mrf.mxu0 }
 0x118   : > { %v781_v48 = vadd.f32 %v2863_v11, %v780_v47  ;;  %2558 = vmatprep.mubr.msk.f32.mxu1 %vm1018_vm2, %v969_v45  ;;  %v972_v49 = vmax.f32 %v786_v46, 0.0 }
 0x119   : > { %v2454_v50 = vpop.f32.mrf.mxu0  ;;  %2559 = vmatmul.mubr.msk.f32.gmra.mxu1 %vm1018_vm2, %v970_v43 }
 0x11a   : > { %v971_v51 = vmax.f32 %v781_v48, 0.0  ;;  %v796_v52 = vadd.f32 %v2454_v50, %v2863_v11 }
 0x11b   : > { %v790_v53 = vpop.f32.mrf.mxu0 }
 0x11c   : > { %v791_v54 = vadd.f32 %v2863_v11, %v790_v53  ;;  %2561 = vmatprep.mubr.msk.f32.mxu1 %vm1018_vm2, %v971_v51  ;;  %v974_v55 = vmax.f32 %v796_v52, 0.0 }
 0x11d   : > { %v2457_v56 = vpop.f32.mrf.mxu0  ;;  %2562 = vmatmul.mubr.msk.f32.gmra.mxu1 %vm1018_vm2, %v972_v49 }
 0x11e   : > { %v973_v57 = vmax.f32 %v791_v54, 0.0  ;;  %v806_v58 = vadd.f32 %v2457_v56, %v2863_v11 }
 0x11f   : > { %v800_v59 = vpop.f32.mrf.mxu0 }
 0x120   : > { %v801_v60 = vadd.f32 %v2863_v11, %v800_v59  ;;  %2564 = vmatprep.mubr.msk.f32.mxu1 %vm1018_vm2, %v973_v57  ;;  %v976_v61 = vmax.f32 %v806_v58, 0.0 }
 0x121   : > { %v2460_v62 = vpop.f32.mrf.mxu0  ;;  %2565 = vmatmul.mubr.msk.f32.gmra.mxu1 %vm1018_vm2, %v974_v55 }
 0x122   : > { %v975_v63 = vmax.f32 %v801_v60, 0.0  ;;  %v816_v0 = vadd.f32 %v2460_v62, %v2863_v11 }
 0x123   : > { %v810_v1 = vpop.f32.mrf.mxu0 }
 0x124   : > { %v811_v2 = vadd.f32 %v2863_v11, %v810_v1  ;;  %2567 = vmatprep.mubr.msk.f32.mxu1 %vm1018_vm2, %v975_v63  ;;  %v978_v3 = vmax.f32 %v816_v0, 0.0 }
 0x125   : > { %v2463_v4 = vpop.f32.mrf.mxu0  ;;  %2568 = vmatmul.mubr.msk.f32.gmra.mxu1 %vm1018_vm2, %v976_v61 }
 0x126   : > { %v977_v5 = vmax.f32 %v811_v2, 0.0  ;;  %v826_v6 = vadd.f32 %v2463_v4, %v2863_v11 }
 0x127   : > { %v820_v7 = vpop.f32.mrf.mxu0 }
 0x128   : > { %v821_v8 = vadd.f32 %v2863_v11, %v820_v7  ;;  %2570 = vmatprep.mubr.msk.f32.mxu1 %vm1018_vm2, %v977_v5  ;;  %v980_v9 = vmax.f32 %v826_v6, 0.0 }
 0x129   : > { %v2466_v10 = vpop.f32.mrf.mxu0  ;;  %2571 = vmatmul.mubr.msk.f32.gmra.mxu1 %vm1018_vm2, %v978_v3 }
 0x12a   : > { %v979_v12 = vmax.f32 %v821_v8, 0.0  ;;  %v836_v13 = vadd.f32 %v2466_v10, %v2863_v11 }
 0x12b   : > { %v830_v14 = vpop.f32.mrf.mxu0 }
 0x12c   : > { %v831_v15 = vadd.f32 %v2863_v11, %v830_v14  ;;  %2573 = vmatprep.mubr.msk.f32.mxu1 %vm1018_vm2, %v979_v12  ;;  %v982_v16 = vmax.f32 %v836_v13, 0.0 }
 0x12d   : > { %v2469_v17 = vpop.f32.mrf.mxu0  ;;  %2574 = vmatmul.mubr.msk.f32.gmra.mxu1 %vm1018_vm2, %v980_v9 }
 0x12e   : > { %v981_v18 = vmax.f32 %v831_v15, 0.0  ;;  %v846_v19 = vadd.f32 %v2469_v17, %v2863_v11  ;;  %v2996_v15 = vld [vmem:[%s3403_s4] ss:$0 sm:$0xff] }
 0x12f   : > { %v840_v20 = vpop.f32.mrf.mxu0 }
 0x130   : > { %v841_v21 = vadd.f32 %v2863_v11, %v840_v20  ;;  %2576 = vmatprep.mubr.msk.f32.mxu1 %vm1018_vm2, %v981_v18  ;;  %v984_v22 = vmax.f32 %v846_v19, 0.0 }
 0x131   : > { %v2472_v23 = vpop.f32.mrf.mxu0  ;;  %2577 = vmatmul.mubr.msk.f32.gmra.mxu1 %vm1018_vm2, %v982_v16 }
 0x132   : > { %v983_v24 = vmax.f32 %v841_v21, 0.0  ;;  %v856_v25 = vadd.f32 %v2472_v23, %v2863_v11 }
 0x133   : > { %v850_v26 = vpop.f32.mrf.mxu0 }
 0x134   : > { %v851_v27 = vadd.f32 %v2863_v11, %v850_v26  ;;  %2579 = vmatprep.mubr.msk.f32.mxu1 %vm1018_vm2, %v983_v24  ;;  %v986_v28 = vmax.f32 %v856_v25, 0.0 }
 0x135   : > { %v2475_v29 = vpop.f32.mrf.mxu0  ;;  %2580 = vmatmul.mubr.msk.f32.gmra.mxu1 %vm1018_vm2, %v984_v22 }
 0x136   : > { %v985_v30 = vmax.f32 %v851_v27, 0.0  ;;  %v866_v31 = vadd.f32 %v2475_v29, %v2863_v11 }
 0x137   : > { %v860_v32 = vpop.f32.mrf.mxu0 }
 0x138   : > { %v861_v33 = vadd.f32 %v2863_v11, %v860_v32  ;;  %2582 = vmatprep.mubr.msk.f32.mxu1 %vm1018_vm2, %v985_v30  ;;  %v988_v34 = vmax.f32 %v866_v31, 0.0 }
 0x139   : > { %v2478_v35 = vpop.f32.mrf.mxu0  ;;  %2583 = vmatmul.mubr.msk.f32.gmra.mxu1 %vm1018_vm2, %v986_v28 }
 0x13a   : > { %v987_v36 = vmax.f32 %v861_v33, 0.0  ;;  %v876_v37 = vadd.f32 %v2478_v35, %v2863_v11 }
 0x13b   : > { %v870_v38 = vpop.f32.mrf.mxu0 }
 0x13c   : > { %v871_v39 = vadd.f32 %v2863_v11, %v870_v38  ;;  %2585 = vmatprep.mubr.msk.f32.mxu1 %vm1018_vm2, %v987_v36  ;;  %v990_v40 = vmax.f32 %v876_v37, 0.0 }
 0x13d   : > { %v2481_v41 = vpop.f32.mrf.mxu0  ;;  %2586 = vmatmul.mubr.msk.f32.gmra.mxu1 %vm1018_vm2, %v988_v34 }
 0x13e   : > { %v989_v42 = vmax.f32 %v871_v39, 0.0  ;;  %v886_v43 = vadd.f32 %v2481_v41, %v2863_v11 }
 0x13f   : > { %v880_v44 = vpop.f32.mrf.mxu0 }
 0x140   : > { %v881_v45 = vadd.f32 %v2863_v11, %v880_v44  ;;  %2588 = vmatprep.mubr.msk.f32.mxu1 %vm1018_vm2, %v989_v42  ;;  %v992_v46 = vmax.f32 %v886_v43, 0.0 }
 0x141   : > { %v2484_v47 = vpop.f32.mrf.mxu0  ;;  %2589 = vmatmul.mubr.msk.f32.gmra.mxu1 %vm1018_vm2, %v990_v40 }
 0x142   : > { %v991_v48 = vmax.f32 %v881_v45, 0.0  ;;  %v896_v49 = vadd.f32 %v2484_v47, %v2863_v11 }
 0x143   : > { %v890_v50 = vpop.f32.mrf.mxu0 }
 0x144   : > { %v891_v51 = vadd.f32 %v2863_v11, %v890_v50  ;;  %2591 = vmatprep.mubr.msk.f32.mxu1 %vm1018_vm2, %v991_v48  ;;  %v994_v52 = vmax.f32 %v896_v49, 0.0 }
 0x145   : > { %v2487_v53 = vpop.f32.mrf.mxu0  ;;  %2592 = vmatmul.mubr.msk.f32.gmra.mxu1 %vm1018_vm2, %v992_v46 }
 0x146   : > { %v993_v54 = vmax.f32 %v891_v51, 0.0  ;;  %v906_v55 = vadd.f32 %v2487_v53, %v2863_v11 }
 0x147   : > { %v900_v56 = vpop.f32.mrf.mxu0 }
 0x148   : > { %v901_v57 = vadd.f32 %v2863_v11, %v900_v56  ;;  %2594 = vmatprep.mubr.msk.f32.mxu1 %vm1018_vm2, %v993_v54  ;;  %v996_v58 = vmax.f32 %v906_v55, 0.0 }
 0x149   : > { %v2490_v59 = vpop.f32.mrf.mxu0  ;;  %2595 = vmatmul.mubr.msk.f32.gmra.mxu1 %vm1018_vm2, %v994_v52 }
 0x14a   : > { %v995_v60 = vmax.f32 %v901_v57, 0.0  ;;  %v916_v61 = vadd.f32 %v2490_v59, %v2863_v11 }
 0x14b   : > { %v910_v62 = vpop.f32.mrf.mxu0 }
 0x14c   : > { %v911_v63 = vadd.f32 %v2863_v11, %v910_v62  ;;  %2597 = vmatprep.mubr.msk.f32.mxu1 %vm1018_vm2, %v995_v60  ;;  %v998_v0 = vmax.f32 %v916_v61, 0.0 }
 0x14d   : > { %v2493_v1 = vpop.f32.mrf.mxu0  ;;  %2598 = vmatmul.mubr.msk.f32.gmra.mxu1 %vm1018_vm2, %v996_v58 }
 0x14e   : > { %v997_v2 = vmax.f32 %v911_v63, 0.0  ;;  %v926_v3 = vadd.f32 %v2493_v1, %v2863_v11 }
 0x14f   : > { %v920_v4 = vpop.f32.mrf.mxu0 }
 0x150   : > { %v921_v5 = vadd.f32 %v2863_v11, %v920_v4  ;;  %2600 = vmatprep.mubr.msk.f32.mxu1 %vm1018_vm2, %v997_v2  ;;  %v1000_v6 = vmax.f32 %v926_v3, 0.0 }
 0x151   : > { %v2496_v7 = vpop.f32.mrf.mxu0  ;;  %2601 = vmatmul.mubr.msk.f32.gmra.mxu1 %vm1018_vm2, %v998_v0 }
 0x152   : > { %v999_v8 = vmax.f32 %v921_v5, 0.0  ;;  %v936_v9 = vadd.f32 %v2496_v7, %v2863_v11 }
 0x153   : > { %v930_v10 = vpop.f32.mrf.mxu0 }
 0x154   : > { %v931_v12 = vadd.f32 %v2863_v11, %v930_v10  ;;  %2603 = vmatprep.mubr.msk.f32.mxu1 %vm1018_vm2, %v999_v8  ;;  %v1002_v13 = vmax.f32 %v936_v9, 0.0  ;;  %v3002_v11 = vld [vmem:[%s3404_s5] ss:$0 sm:$0xff] }
 0x155   : > { %2604 = vmatmul.mubr.msk.f32.gmra.mxu1 %vm1018_vm2, %v1000_v6 }
 0x156   : > { %v1001_v14 = vmax.f32 %v931_v12, 0.0 }
 0x158   : > { %2606 = vmatprep.mubr.msk.f32.mxu1 %vm1018_vm2, %v1001_v14 }
 0x159   : > { %2607 = vmatmul.mubr.msk.f32.gmra.mxu1 %vm1018_vm2, %v1002_v13 }
 0x19c   : > { %v2515_v16 = vpop.f32.mrf.mxu0 }
 0x19d   : > { %v1283_v17 = vadd.f32 %v2515_v16, %v2996_v15 }
 0x19e   : > { %v1277_v18 = vpop.f32.mrf.mxu0 }
 0x19f   : > { %v1597_v19 = vmax.f32 %v1283_v17, 0.0  ;;  %v1278_v20 = vadd.f32 %v2996_v15, %v1277_v18 }
 0x1a1   : > { %v2518_v21 = vpop.f32.mrf.mxu1  ;;  %v1596_v22 = vmax.f32 %v1278_v20, 0.0  ;;  %v1668_v24 = vmul.f32 %v3002_v11, %v1597_v19 }
 0x1a2   : > { %v1293_v23 = vadd.f32 %v2518_v21, %v2996_v15 }
 0x1a3   : > { %v1287_v25 = vpop.f32.mrf.mxu1  ;;  %v1734_v28 = vsel %vm1018_vm2, %v1668_v24, 0.0  ;;  %v1667_v29 = vmul.f32 %v3002_v11, %v1596_v22 }
 0x1a4   : > { %v1599_v26 = vmax.f32 %v1293_v23, 0.0  ;;  %v1288_v27 = vadd.f32 %v2996_v15, %v1287_v25  ;;  %1735 = vadd.xlane.f32.xlu0 %v1734_v28 }
 0x1a5   : > { %v2521_v30 = vpop.f32.mrf.mxu1  ;;  %v1731_v35 = vsel %vm1018_vm2, %v1667_v29, 0.0 }
 0x1a6   : > { %v1598_v31 = vmax.f32 %v1288_v27, 0.0  ;;  %v1303_v32 = vadd.f32 %v2521_v30, %v2996_v15  ;;  %v1670_v33 = vmul.f32 %v3002_v11, %v1599_v26 }
 0x1a7   : > { %v1297_v34 = vpop.f32.mrf.mxu1 }
 0x1a8   : > { %v1601_v36 = vmax.f32 %v1303_v32, 0.0  ;;  %v1298_v37 = vadd.f32 %v2996_v15, %v1297_v34  ;;  %v1740_v38 = vsel %vm1018_vm2, %v1670_v33, 0.0  ;;  %v1669_v39 = vmul.f32 %v3002_v11, %v1598_v31  ;;  %1732 = vadd.xlane.f32.xlu0 %v1731_v35 }
 0x1a9   : > { %1741 = vadd.xlane.f32.xlu1 %v1740_v38  ;;  %v2524_v40 = vpop.f32.mrf.mxu1 }
 0x1aa   : > { %v1600_v41 = vmax.f32 %v1298_v37, 0.0  ;;  %v1313_v42 = vadd.f32 %v2524_v40, %v2996_v15  ;;  %v1737_v44 = vsel %vm1018_vm2, %v1669_v39, 0.0  ;;  %v1672_v48 = vmul.f32 %v3002_v11, %v1601_v36 }
 0x1ab   : > { %v1307_v43 = vpop.f32.mrf.mxu1 }
 0x1ac   : > { %v1603_v45 = vmax.f32 %v1313_v42, 0.0  ;;  %v1308_v46 = vadd.f32 %v2996_v15, %v1307_v43  ;;  %v1671_v47 = vmul.f32 %v3002_v11, %v1600_v41  ;;  %v1746_v57 = vsel %vm1018_vm2, %v1672_v48, 0.0 }
 0x1ad   : > { %v2527_v49 = vpop.f32.mrf.mxu1  ;;  %1738 = vadd.xlane.f32.xlu1 %v1737_v44 }
 0x1ae   : > { %v1602_v50 = vmax.f32 %v1308_v46, 0.0  ;;  %v1323_v51 = vadd.f32 %v2527_v49, %v2996_v15  ;;  %v1743_v52 = vsel %vm1018_vm2, %v1671_v47, 0.0  ;;  %v1674_v54 = vmul.f32 %v3002_v11, %v1603_v45 }
 0x1af   : > { %v1317_v53 = vpop.f32.mrf.mxu1  ;;  %1744 = vadd.xlane.f32.xlu0 %v1743_v52 }
 0x1b0   : > { %v1605_v55 = vmax.f32 %v1323_v51, 0.0  ;;  %v1318_v56 = vadd.f32 %v2996_v15, %v1317_v53  ;;  %v1673_v58 = vmul.f32 %v3002_v11, %v1602_v50  ;;  %v1752_v0 = vsel %vm1018_vm2, %v1674_v54, 0.0 }
 0x1b1   : > { %v2530_v59 = vpop.f32.mrf.mxu1  ;;  %1747 = vadd.xlane.f32.xlu1 %v1746_v57 }
 0x1b2   : > { %v1604_v60 = vmax.f32 %v1318_v56, 0.0  ;;  %v1333_v61 = vadd.f32 %v2530_v59, %v2996_v15  ;;  %v1749_v62 = vsel %vm1018_vm2, %v1673_v58, 0.0  ;;  %v1676_v4 = vmul.f32 %v3002_v11, %v1605_v55 }
 0x1b3   : > { %v1327_v63 = vpop.f32.mrf.mxu1  ;;  %1750 = vadd.xlane.f32.xlu0 %v1749_v62 }
 0x1b4   : > { %v1607_v1 = vmax.f32 %v1333_v61, 0.0  ;;  %v1328_v2 = vadd.f32 %v2996_v15, %v1327_v63  ;;  %v1675_v3 = vmul.f32 %v3002_v11, %v1604_v60  ;;  %v1758_v14 = vsel %vm1018_vm2, %v1676_v4, 0.0 }
 0x1b5   : > { %v2533_v5 = vpop.f32.mrf.mxu1  ;;  %1753 = vadd.xlane.f32.xlu1 %v1752_v0 }
 0x1b6   : > { %v1606_v6 = vmax.f32 %v1328_v2, 0.0  ;;  %v1343_v7 = vadd.f32 %v2533_v5, %v2996_v15  ;;  %v1755_v8 = vsel %vm1018_vm2, %v1675_v3, 0.0  ;;  %v1678_v10 = vmul.f32 %v3002_v11, %v1607_v1 }
 0x1b7   : > { %v1337_v9 = vpop.f32.mrf.mxu1  ;;  %1756 = vadd.xlane.f32.xlu0 %v1755_v8 }
 0x1b8   : > { %v1609_v12 = vmax.f32 %v1343_v7, 0.0  ;;  %v1338_v13 = vadd.f32 %v2996_v15, %v1337_v9  ;;  %v1677_v16 = vmul.f32 %v3002_v11, %v1606_v6  ;;  %v1764_v22 = vsel %vm1018_vm2, %v1678_v10, 0.0 }
 0x1b9   : > { %v2536_v17 = vpop.f32.mrf.mxu1  ;;  %1759 = vadd.xlane.f32.xlu1 %v1758_v14 }
 0x1ba   : > { %v1608_v18 = vmax.f32 %v1338_v13, 0.0  ;;  %v1353_v19 = vadd.f32 %v2536_v17, %v2996_v15  ;;  %v1761_v20 = vsel %vm1018_vm2, %v1677_v16, 0.0  ;;  %v1680_v26 = vmul.f32 %v3002_v11, %v1609_v12 }
 0x1bb   : > { %v1347_v21 = vpop.f32.mrf.mxu1  ;;  %1762 = vadd.xlane.f32.xlu0 %v1761_v20 }
 0x1bc   : > { %v1611_v23 = vmax.f32 %v1353_v19, 0.0  ;;  %v1348_v24 = vadd.f32 %v2996_v15, %v1347_v21  ;;  %v1679_v25 = vmul.f32 %v3002_v11, %v1608_v18  ;;  %v1770_v35 = vsel %vm1018_vm2, %v1680_v26, 0.0 }
 0x1bd   : > { %v2539_v27 = vpop.f32.mrf.mxu1  ;;  %1765 = vadd.xlane.f32.xlu1 %v1764_v22 }
 0x1be   : > { %v1610_v28 = vmax.f32 %v1348_v24, 0.0  ;;  %v1363_v29 = vadd.f32 %v2539_v27, %v2996_v15  ;;  %v1767_v30 = vsel %vm1018_vm2, %v1679_v25, 0.0  ;;  %v1682_v32 = vmul.f32 %v3002_v11, %v1611_v23 }
 0x1bf   : > { %v1357_v31 = vpop.f32.mrf.mxu1  ;;  %1768 = vadd.xlane.f32.xlu0 %v1767_v30 }
 0x1c0   : > { %v1613_v33 = vmax.f32 %v1363_v29, 0.0  ;;  %v1358_v34 = vadd.f32 %v2996_v15, %v1357_v31  ;;  %v1681_v36 = vmul.f32 %v3002_v11, %v1610_v28  ;;  %v1776_v42 = vsel %vm1018_vm2, %v1682_v32, 0.0 }
 0x1c1   : > { %v2542_v37 = vpop.f32.mrf.mxu1  ;;  %1771 = vadd.xlane.f32.xlu1 %v1770_v35 }
 0x1c2   : > { %v1612_v38 = vmax.f32 %v1358_v34, 0.0  ;;  %v1373_v39 = vadd.f32 %v2542_v37, %v2996_v15  ;;  %v1773_v40 = vsel %vm1018_vm2, %v1681_v36, 0.0  ;;  %v1684_v46 = vmul.f32 %v3002_v11, %v1613_v33 }
 0x1c3   : > { %v1367_v41 = vpop.f32.mrf.mxu1  ;;  %1774 = vadd.xlane.f32.xlu0 %v1773_v40 }
 0x1c4   : > { %v1615_v43 = vmax.f32 %v1373_v39, 0.0  ;;  %v1368_v44 = vadd.f32 %v2996_v15, %v1367_v41  ;;  %v1683_v45 = vmul.f32 %v3002_v11, %v1612_v38  ;;  %v1782_v55 = vsel %vm1018_vm2, %v1684_v46, 0.0 }
 0x1c5   : > { %v2545_v47 = vpop.f32.mrf.mxu1  ;;  %1777 = vadd.xlane.f32.xlu1 %v1776_v42 }
 0x1c6   : > { %v1614_v48 = vmax.f32 %v1368_v44, 0.0  ;;  %v1383_v49 = vadd.f32 %v2545_v47, %v2996_v15  ;;  %v1779_v50 = vsel %vm1018_vm2, %v1683_v45, 0.0  ;;  %v1686_v52 = vmul.f32 %v3002_v11, %v1615_v43 }
 0x1c7   : > { %v1377_v51 = vpop.f32.mrf.mxu1  ;;  %1780 = vadd.xlane.f32.xlu0 %v1779_v50 }
 0x1c8   : > { %v1617_v53 = vmax.f32 %v1383_v49, 0.0  ;;  %v1378_v54 = vadd.f32 %v2996_v15, %v1377_v51  ;;  %v1685_v56 = vmul.f32 %v3002_v11, %v1614_v48  ;;  %v1788_v62 = vsel %vm1018_vm2, %v1686_v52, 0.0 }
 0x1c9   : > { %v2548_v57 = vpop.f32.mrf.mxu1  ;;  %1783 = vadd.xlane.f32.xlu1 %v1782_v55 }
 0x1ca   : > { %v1616_v58 = vmax.f32 %v1378_v54, 0.0  ;;  %v1393_v59 = vadd.f32 %v2548_v57, %v2996_v15  ;;  %v1785_v60 = vsel %vm1018_vm2, %v1685_v56, 0.0  ;;  %v1688_v2 = vmul.f32 %v3002_v11, %v1617_v53 }
 0x1cb   : > { %v1387_v61 = vpop.f32.mrf.mxu1  ;;  %1786 = vadd.xlane.f32.xlu0 %v1785_v60 }
 0x1cc   : > { %v1619_v63 = vmax.f32 %v1393_v59, 0.0  ;;  %v1388_v0 = vadd.f32 %v2996_v15, %v1387_v61  ;;  %v1687_v1 = vmul.f32 %v3002_v11, %v1616_v58  ;;  %v1794_v12 = vsel %vm1018_vm2, %v1688_v2, 0.0 }
 0x1cd   : > { %v2551_v3 = vpop.f32.mrf.mxu1  ;;  %1789 = vadd.xlane.f32.xlu1 %v1788_v62 }
 0x1ce   : > { %v1618_v4 = vmax.f32 %v1388_v0, 0.0  ;;  %v1403_v5 = vadd.f32 %v2551_v3, %v2996_v15  ;;  %v1791_v6 = vsel %vm1018_vm2, %v1687_v1, 0.0  ;;  %v1690_v8 = vmul.f32 %v3002_v11, %v1619_v63 }
 0x1cf   : > { %v1397_v7 = vpop.f32.mrf.mxu1  ;;  %1792 = vadd.xlane.f32.xlu0 %v1791_v6 }
 0x1d0   : > { %v1621_v9 = vmax.f32 %v1403_v5, 0.0  ;;  %v1398_v10 = vadd.f32 %v2996_v15, %v1397_v7  ;;  %v1689_v13 = vmul.f32 %v3002_v11, %v1618_v4  ;;  %v1800_v20 = vsel %vm1018_vm2, %v1690_v8, 0.0 }
 0x1d1   : > { %v2554_v14 = vpop.f32.mrf.mxu1  ;;  %1795 = vadd.xlane.f32.xlu1 %v1794_v12 }
 0x1d2   : > { %v1620_v16 = vmax.f32 %v1398_v10, 0.0  ;;  %v1413_v17 = vadd.f32 %v2554_v14, %v2996_v15  ;;  %v1797_v18 = vsel %vm1018_vm2, %v1689_v13, 0.0  ;;  %v1692_v24 = vmul.f32 %v3002_v11, %v1621_v9 }
 0x1d3   : > { %v1407_v19 = vpop.f32.mrf.mxu1  ;;  %1798 = vadd.xlane.f32.xlu0 %v1797_v18 }
 0x1d4   : > { %v1623_v21 = vmax.f32 %v1413_v17, 0.0  ;;  %v1408_v22 = vadd.f32 %v2996_v15, %v1407_v19  ;;  %v1691_v23 = vmul.f32 %v3002_v11, %v1620_v16  ;;  %v1806_v33 = vsel %vm1018_vm2, %v1692_v24, 0.0 }
 0x1d5   : > { %v2557_v25 = vpop.f32.mrf.mxu1  ;;  %1801 = vadd.xlane.f32.xlu1 %v1800_v20 }
 0x1d6   : > { %v1622_v26 = vmax.f32 %v1408_v22, 0.0  ;;  %v1423_v27 = vadd.f32 %v2557_v25, %v2996_v15  ;;  %v1803_v28 = vsel %vm1018_vm2, %v1691_v23, 0.0  ;;  %v1694_v30 = vmul.f32 %v3002_v11, %v1623_v21 }
 0x1d7   : > { %v1417_v29 = vpop.f32.mrf.mxu1  ;;  %1804 = vadd.xlane.f32.xlu0 %v1803_v28 }
 0x1d8   : > { %v1625_v31 = vmax.f32 %v1423_v27, 0.0  ;;  %v1418_v32 = vadd.f32 %v2996_v15, %v1417_v29  ;;  %v1693_v34 = vmul.f32 %v3002_v11, %v1622_v26  ;;  %v1812_v40 = vsel %vm1018_vm2, %v1694_v30, 0.0 }
 0x1d9   : > { %v2560_v35 = vpop.f32.mrf.mxu1  ;;  %1807 = vadd.xlane.f32.xlu1 %v1806_v33 }
 0x1da   : > { %v1624_v36 = vmax.f32 %v1418_v32, 0.0  ;;  %v1433_v37 = vadd.f32 %v2560_v35, %v2996_v15  ;;  %v1809_v38 = vsel %vm1018_vm2, %v1693_v34, 0.0  ;;  %v1696_v44 = vmul.f32 %v3002_v11, %v1625_v31 }
 0x1db   : > { %v1427_v39 = vpop.f32.mrf.mxu1  ;;  %1810 = vadd.xlane.f32.xlu0 %v1809_v38 }
 0x1dc   : > { %v1627_v41 = vmax.f32 %v1433_v37, 0.0  ;;  %v1428_v42 = vadd.f32 %v2996_v15, %v1427_v39  ;;  %v1695_v43 = vmul.f32 %v3002_v11, %v1624_v36  ;;  %v1818_v53 = vsel %vm1018_vm2, %v1696_v44, 0.0 }
 0x1dd   : > { %v2563_v45 = vpop.f32.mrf.mxu1  ;;  %1813 = vadd.xlane.f32.xlu1 %v1812_v40 }
 0x1de   : > { %v1626_v46 = vmax.f32 %v1428_v42, 0.0  ;;  %v1443_v47 = vadd.f32 %v2563_v45, %v2996_v15  ;;  %v1815_v48 = vsel %vm1018_vm2, %v1695_v43, 0.0  ;;  %v1698_v50 = vmul.f32 %v3002_v11, %v1627_v41 }
 0x1df   : > { %v1437_v49 = vpop.f32.mrf.mxu1  ;;  %1816 = vadd.xlane.f32.xlu0 %v1815_v48 }
 0x1e0   : > { %v1629_v51 = vmax.f32 %v1443_v47, 0.0  ;;  %v1438_v52 = vadd.f32 %v2996_v15, %v1437_v49  ;;  %v1697_v54 = vmul.f32 %v3002_v11, %v1626_v46  ;;  %v1824_v60 = vsel %vm1018_vm2, %v1698_v50, 0.0 }
 0x1e1   : > { %v2566_v55 = vpop.f32.mrf.mxu1  ;;  %1819 = vadd.xlane.f32.xlu1 %v1818_v53 }
 0x1e2   : > { %v1628_v56 = vmax.f32 %v1438_v52, 0.0  ;;  %v1453_v57 = vadd.f32 %v2566_v55, %v2996_v15  ;;  %v1821_v58 = vsel %vm1018_vm2, %v1697_v54, 0.0  ;;  %v1700_v0 = vmul.f32 %v3002_v11, %v1629_v51 }
 0x1e3   : > { %v1447_v59 = vpop.f32.mrf.mxu1  ;;  %1822 = vadd.xlane.f32.xlu0 %v1821_v58 }
 0x1e4   : > { %v1631_v61 = vmax.f32 %v1453_v57, 0.0  ;;  %v1448_v62 = vadd.f32 %v2996_v15, %v1447_v59  ;;  %v1699_v63 = vmul.f32 %v3002_v11, %v1628_v56  ;;  %v1830_v9 = vsel %vm1018_vm2, %v1700_v0, 0.0 }
 0x1e5   : > { %v2569_v1 = vpop.f32.mrf.mxu1  ;;  %1825 = vadd.xlane.f32.xlu1 %v1824_v60 }
 0x1e6   : > { %v1630_v2 = vmax.f32 %v1448_v62, 0.0  ;;  %v1463_v3 = vadd.f32 %v2569_v1, %v2996_v15  ;;  %v1827_v4 = vsel %vm1018_vm2, %v1699_v63, 0.0  ;;  %v1702_v6 = vmul.f32 %v3002_v11, %v1631_v61 }
 0x1e7   : > { %v1457_v5 = vpop.f32.mrf.mxu1  ;;  %1828 = vadd.xlane.f32.xlu0 %v1827_v4 }
 0x1e8   : > { %v1633_v7 = vmax.f32 %v1463_v3, 0.0  ;;  %v1458_v8 = vadd.f32 %v2996_v15, %v1457_v5  ;;  %v1701_v10 = vmul.f32 %v3002_v11, %v1630_v2  ;;  %v1836_v18 = vsel %vm1018_vm2, %v1702_v6, 0.0 }
 0x1e9   : > { %v2572_v12 = vpop.f32.mrf.mxu1  ;;  %1831 = vadd.xlane.f32.xlu1 %v1830_v9 }
 0x1ea   : > { %v1632_v13 = vmax.f32 %v1458_v8, 0.0  ;;  %v1473_v14 = vadd.f32 %v2572_v12, %v2996_v15  ;;  %v1833_v16 = vsel %vm1018_vm2, %v1701_v10, 0.0  ;;  %v1704_v22 = vmul.f32 %v3002_v11, %v1633_v7 }
 0x1eb   : > { %v1467_v17 = vpop.f32.mrf.mxu1  ;;  %1834 = vadd.xlane.f32.xlu0 %v1833_v16 }
 0x1ec   : > { %v1635_v19 = vmax.f32 %v1473_v14, 0.0  ;;  %v1468_v20 = vadd.f32 %v2996_v15, %v1467_v17  ;;  %v1703_v21 = vmul.f32 %v3002_v11, %v1632_v13  ;;  %v1842_v31 = vsel %vm1018_vm2, %v1704_v22, 0.0 }
 0x1ed   : > { %v2575_v23 = vpop.f32.mrf.mxu1  ;;  %1837 = vadd.xlane.f32.xlu1 %v1836_v18 }
 0x1ee   : > { %v1634_v24 = vmax.f32 %v1468_v20, 0.0  ;;  %v1483_v25 = vadd.f32 %v2575_v23, %v2996_v15  ;;  %v1839_v26 = vsel %vm1018_vm2, %v1703_v21, 0.0  ;;  %v1706_v28 = vmul.f32 %v3002_v11, %v1635_v19 }
 0x1ef   : > { %v1477_v27 = vpop.f32.mrf.mxu1  ;;  %1840 = vadd.xlane.f32.xlu0 %v1839_v26 }
 0x1f0   : > { %v1637_v29 = vmax.f32 %v1483_v25, 0.0  ;;  %v1478_v30 = vadd.f32 %v2996_v15, %v1477_v27  ;;  %v1705_v32 = vmul.f32 %v3002_v11, %v1634_v24  ;;  %v1848_v38 = vsel %vm1018_vm2, %v1706_v28, 0.0 }
 0x1f1   : > { %v2578_v33 = vpop.f32.mrf.mxu1  ;;  %1843 = vadd.xlane.f32.xlu1 %v1842_v31 }
 0x1f2   : > { %v1636_v34 = vmax.f32 %v1478_v30, 0.0  ;;  %v1493_v35 = vadd.f32 %v2578_v33, %v2996_v15  ;;  %v1845_v36 = vsel %vm1018_vm2, %v1705_v32, 0.0  ;;  %v1708_v42 = vmul.f32 %v3002_v11, %v1637_v29 }
 0x1f3   : > { %v1487_v37 = vpop.f32.mrf.mxu1  ;;  %1846 = vadd.xlane.f32.xlu0 %v1845_v36 }
 0x1f4   : > { %v1639_v39 = vmax.f32 %v1493_v35, 0.0  ;;  %v1488_v40 = vadd.f32 %v2996_v15, %v1487_v37  ;;  %v1707_v41 = vmul.f32 %v3002_v11, %v1636_v34  ;;  %v1854_v51 = vsel %vm1018_vm2, %v1708_v42, 0.0 }
 0x1f5   : > { %v2581_v43 = vpop.f32.mrf.mxu1  ;;  %1849 = vadd.xlane.f32.xlu1 %v1848_v38 }
 0x1f6   : > { %v1638_v44 = vmax.f32 %v1488_v40, 0.0  ;;  %v1503_v45 = vadd.f32 %v2581_v43, %v2996_v15  ;;  %v1851_v46 = vsel %vm1018_vm2, %v1707_v41, 0.0  ;;  %v1710_v48 = vmul.f32 %v3002_v11, %v1639_v39 }
 0x1f7   : > { %v1497_v47 = vpop.f32.mrf.mxu1  ;;  %1852 = vadd.xlane.f32.xlu0 %v1851_v46 }
 0x1f8   : > { %v1641_v49 = vmax.f32 %v1503_v45, 0.0  ;;  %v1498_v50 = vadd.f32 %v2996_v15, %v1497_v47  ;;  %v1709_v52 = vmul.f32 %v3002_v11, %v1638_v44  ;;  %v1860_v58 = vsel %vm1018_vm2, %v1710_v48, 0.0 }
 0x1f9   : > { %v2584_v53 = vpop.f32.mrf.mxu1  ;;  %1855 = vadd.xlane.f32.xlu1 %v1854_v51 }
 0x1fa   : > { %v1640_v54 = vmax.f32 %v1498_v50, 0.0  ;;  %v1513_v55 = vadd.f32 %v2584_v53, %v2996_v15  ;;  %v1857_v56 = vsel %vm1018_vm2, %v1709_v52, 0.0  ;;  %v1712_v62 = vmul.f32 %v3002_v11, %v1641_v49 }
 0x1fb   : > { %v1507_v57 = vpop.f32.mrf.mxu1  ;;  %1858 = vadd.xlane.f32.xlu0 %v1857_v56 }
 0x1fc   : > { %v1643_v59 = vmax.f32 %v1513_v55, 0.0  ;;  %v1508_v60 = vadd.f32 %v2996_v15, %v1507_v57  ;;  %v1711_v61 = vmul.f32 %v3002_v11, %v1640_v54  ;;  %v1866_v7 = vsel %vm1018_vm2, %v1712_v62, 0.0 }
 0x1fd   : > { %v2587_v63 = vpop.f32.mrf.mxu1  ;;  %1861 = vadd.xlane.f32.xlu1 %v1860_v58 }
 0x1fe   : > { %v1642_v0 = vmax.f32 %v1508_v60, 0.0  ;;  %v1523_v1 = vadd.f32 %v2587_v63, %v2996_v15  ;;  %v1863_v2 = vsel %vm1018_vm2, %v1711_v61, 0.0  ;;  %v1714_v4 = vmul.f32 %v3002_v11, %v1643_v59 }
 0x1ff   : > { %v1517_v3 = vpop.f32.mrf.mxu1  ;;  %1864 = vadd.xlane.f32.xlu0 %v1863_v2 }
 0x200   : > { %v1645_v5 = vmax.f32 %v1523_v1, 0.0  ;;  %v1518_v6 = vadd.f32 %v2996_v15, %v1517_v3  ;;  %v1713_v8 = vmul.f32 %v3002_v11, %v1642_v0  ;;  %v1872_v16 = vsel %vm1018_vm2, %v1714_v4, 0.0 }
 0x201   : > { %v2590_v9 = vpop.f32.mrf.mxu1  ;;  %1867 = vadd.xlane.f32.xlu1 %v1866_v7 }
 0x202   : > { %v1644_v10 = vmax.f32 %v1518_v6, 0.0  ;;  %v1533_v12 = vadd.f32 %v2590_v9, %v2996_v15  ;;  %v1869_v13 = vsel %vm1018_vm2, %v1713_v8, 0.0  ;;  %v1716_v20 = vmul.f32 %v3002_v11, %v1645_v5 }
 0x203   : > { %v1527_v14 = vpop.f32.mrf.mxu1  ;;  %1870 = vadd.xlane.f32.xlu0 %v1869_v13 }
 0x204   : > { %v1647_v17 = vmax.f32 %v1533_v12, 0.0  ;;  %v1528_v18 = vadd.f32 %v2996_v15, %v1527_v14  ;;  %v1715_v19 = vmul.f32 %v3002_v11, %v1644_v10  ;;  %v1878_v29 = vsel %vm1018_vm2, %v1716_v20, 0.0 }
 0x205   : > { %v2593_v21 = vpop.f32.mrf.mxu1  ;;  %1873 = vadd.xlane.f32.xlu1 %v1872_v16 }
 0x206   : > { %v1646_v22 = vmax.f32 %v1528_v18, 0.0  ;;  %v1543_v23 = vadd.f32 %v2593_v21, %v2996_v15  ;;  %v1875_v24 = vsel %vm1018_vm2, %v1715_v19, 0.0  ;;  %v1718_v26 = vmul.f32 %v3002_v11, %v1647_v17 }
 0x207   : > { %v1537_v25 = vpop.f32.mrf.mxu1  ;;  %1876 = vadd.xlane.f32.xlu0 %v1875_v24 }
 0x208   : > { %v1649_v27 = vmax.f32 %v1543_v23, 0.0  ;;  %v1538_v28 = vadd.f32 %v2996_v15, %v1537_v25  ;;  %v1717_v30 = vmul.f32 %v3002_v11, %v1646_v22  ;;  %v1884_v36 = vsel %vm1018_vm2, %v1718_v26, 0.0  ;;  %v3195_v25 = vld [vmem:[#allocation2] ss:$0 sm:$0xff] }
 0x209   : > { %v2596_v31 = vpop.f32.mrf.mxu1  ;;  %1879 = vadd.xlane.f32.xlu1 %v1878_v29 }
 0x20a   : > { %v1648_v32 = vmax.f32 %v1538_v28, 0.0  ;;  %v1553_v33 = vadd.f32 %v2596_v31, %v2996_v15  ;;  %v1881_v34 = vsel %vm1018_vm2, %v1717_v30, 0.0  ;;  %v1720_v40 = vmul.f32 %v3002_v11, %v1649_v27 }
 0x20b   : > { %v1547_v35 = vpop.f32.mrf.mxu1  ;;  %1882 = vadd.xlane.f32.xlu0 %v1881_v34 }
 0x20c   : > { %v1651_v37 = vmax.f32 %v1553_v33, 0.0  ;;  %v1548_v38 = vadd.f32 %v2996_v15, %v1547_v35  ;;  %v1719_v39 = vmul.f32 %v3002_v11, %v1648_v32  ;;  %v1890_v49 = vsel %vm1018_vm2, %v1720_v40, 0.0 }
 0x20d   : > { %v2599_v41 = vpop.f32.mrf.mxu1  ;;  %1885 = vadd.xlane.f32.xlu1 %v1884_v36 }
 0x20e   : > { %v1650_v42 = vmax.f32 %v1548_v38, 0.0  ;;  %v1563_v43 = vadd.f32 %v2599_v41, %v2996_v15  ;;  %v1887_v44 = vsel %vm1018_vm2, %v1719_v39, 0.0  ;;  %v1722_v46 = vmul.f32 %v3002_v11, %v1651_v37 }
 0x20f   : > { %v1557_v45 = vpop.f32.mrf.mxu1  ;;  %1888 = vadd.xlane.f32.xlu0 %v1887_v44 }
 0x210   : > { %v1653_v47 = vmax.f32 %v1563_v43, 0.0  ;;  %v1558_v48 = vadd.f32 %v2996_v15, %v1557_v45  ;;  %v1721_v50 = vmul.f32 %v3002_v11, %v1650_v42  ;;  %v1896_v56 = vsel %vm1018_vm2, %v1722_v46, 0.0 }
 0x211   : > { %v2602_v51 = vpop.f32.mrf.mxu1  ;;  %1891 = vadd.xlane.f32.xlu1 %v1890_v49 }
 0x212   : > { %v1652_v52 = vmax.f32 %v1558_v48, 0.0  ;;  %v1573_v53 = vadd.f32 %v2602_v51, %v2996_v15  ;;  %v1893_v54 = vsel %vm1018_vm2, %v1721_v50, 0.0  ;;  %v1724_v60 = vmul.f32 %v3002_v11, %v1653_v47 }
 0x213   : > { %v1567_v55 = vpop.f32.mrf.mxu1  ;;  %1894 = vadd.xlane.f32.xlu0 %v1893_v54 }
 0x214   : > { %v1655_v57 = vmax.f32 %v1573_v53, 0.0  ;;  %v1568_v58 = vadd.f32 %v2996_v15, %v1567_v55  ;;  %v1723_v59 = vmul.f32 %v3002_v11, %v1652_v52  ;;  %v1902_v5 = vsel %vm1018_vm2, %v1724_v60, 0.0 }
 0x215   : > { %v2605_v61 = vpop.f32.mrf.mxu1  ;;  %1897 = vadd.xlane.f32.xlu1 %v1896_v56 }
 0x216   : > { %v1654_v62 = vmax.f32 %v1568_v58, 0.0  ;;  %v1583_v63 = vadd.f32 %v2605_v61, %v2996_v15  ;;  %v1899_v0 = vsel %vm1018_vm2, %v1723_v59, 0.0  ;;  %v1726_v2 = vmul.f32 %v3002_v11, %v1655_v57 }
 0x217   : > { %v1577_v1 = vpop.f32.mrf.mxu1  ;;  %1900 = vadd.xlane.f32.xlu0 %v1899_v0 }
 0x218   : > { %v1657_v3 = vmax.f32 %v1583_v63, 0.0  ;;  %v1578_v4 = vadd.f32 %v2996_v15, %v1577_v1  ;;  %v1725_v6 = vmul.f32 %v3002_v11, %v1654_v62  ;;  %v1908_v13 = vsel %vm1018_vm2, %v1726_v2, 0.0 }
 0x219   : > { %v2608_v7 = vpop.f32.mrf.mxu1  ;;  %1903 = vadd.xlane.f32.xlu1 %v1902_v5 }
 0x21a   : > { %v1656_v8 = vmax.f32 %v1578_v4, 0.0  ;;  %v1593_v9 = vadd.f32 %v2608_v7, %v2996_v15  ;;  %v1905_v10 = vsel %vm1018_vm2, %v1725_v6, 0.0  ;;  %v1728_v18 = vmul.f32 %v3002_v11, %v1657_v3 }
 0x21b   : > { %v1587_v12 = vpop.f32.mrf.mxu1  ;;  %1906 = vadd.xlane.f32.xlu0 %v1905_v10 }
 0x21c   : > { %v1659_v14 = vmax.f32 %v1593_v9, 0.0  ;;  %v1588_v16 = vadd.f32 %v2996_v15, %v1587_v12  ;;  %v1727_v17 = vmul.f32 %v3002_v11, %v1656_v8  ;;  %v1914_v21 = vsel %vm1018_vm2, %v1728_v18, 0.0 }
 0x21d   : > { %1909 = vadd.xlane.f32.xlu1 %v1908_v13 }
 0x21e   : > { %v1658_v19 = vmax.f32 %v1588_v16, 0.0  ;;  %v1911_v20 = vsel %vm1018_vm2, %v1727_v17, 0.0  ;;  %v1730_v23 = vmul.f32 %v3002_v11, %v1659_v14 }
 0x21f   : > { %1912 = vadd.xlane.f32.xlu0 %v1911_v20 }
 0x220   : > { %v1729_v22 = vmul.f32 %v3002_v11, %v1658_v19  ;;  %v1920_v15 = vsel %vm1018_vm2, %v1730_v23, 0.0 }
 0x221   : > { %1915 = vadd.xlane.f32.xlu1 %v1914_v21 }
 0x222   : > { %v1917_v24 = vsel %vm1018_vm2, %v1729_v22, 0.0 }
 0x223   : > { %1918 = vadd.xlane.f32.xlu0 %v1917_v24 }
 0x225   : > { %1921 = vadd.xlane.f32.xlu1 %v1920_v15 }
 0x22d   : > { %v1736_v11 = vpop.xlane.xlu0 %1735 }
 0x22e   : > { %v1931_v26 = vadd.f32 %v3195_v25, %v1736_v11 }
 0x230   : > { %1996 = vst.msk [vmem:[%s3202_s16 + $0x8] sm:$0xff] %vm1994_vm3, %v1931_v26 }
 0x231   : > { %v1733_v28 = vpop.xlane.xlu0 %1732 }
 0x232   : > { %v1742_v27 = vpop.xlane.xlu1 %1741  ;;  %v1930_v30 = vadd.f32 %v3195_v25, %v1733_v28 }
 0x233   : > { %v1933_v29 = vadd.f32 %v3195_v25, %v1742_v27 }
 0x234   : > { %1995 = vst.msk [vmem:[%s3202_s16] sm:$0xff] %vm1994_vm3, %v1930_v30 }
 0x235   : > { %1998 = vst.msk [vmem:[%s3202_s16 + $0x18] sm:$0xff] %vm1994_vm3, %v1933_v29 }
 0x236   : > { %v1739_v31 = vpop.xlane.xlu1 %1738 }
 0x237   : > { %v1932_v32 = vadd.f32 %v3195_v25, %v1739_v31 }
 0x238   : > { %v1745_v33 = vpop.xlane.xlu0 %1744 }
 0x239   : > { %1997 = vst.msk [vmem:[%s3202_s16 + $0x10] sm:$0xff] %vm1994_vm3, %v1932_v32  ;;  %v1934_v34 = vadd.f32 %v3195_v25, %v1745_v33 }
 0x23a   : > { %v1748_v35 = vpop.xlane.xlu1 %1747 }
 0x23b   : > { %1999 = vst.msk [vmem:[%s3202_s16 + $0x20] sm:$0xff] %vm1994_vm3, %v1934_v34  ;;  %v1935_v36 = vadd.f32 %v3195_v25, %v1748_v35 }
 0x23c   : > { %v1751_v37 = vpop.xlane.xlu0 %1750 }
 0x23d   : > { %2000 = vst.msk [vmem:[%s3202_s16 + $0x28] sm:$0xff] %vm1994_vm3, %v1935_v36  ;;  %v1936_v38 = vadd.f32 %v3195_v25, %v1751_v37 }
 0x23e   : > { %v1754_v39 = vpop.xlane.xlu1 %1753 }
 0x23f   : > { %2001 = vst.msk [vmem:[%s3202_s16 + $0x30] sm:$0xff] %vm1994_vm3, %v1936_v38  ;;  %v1937_v40 = vadd.f32 %v3195_v25, %v1754_v39 }
 0x240   : > { %v1757_v41 = vpop.xlane.xlu0 %1756 }
 0x241   : > { %2002 = vst.msk [vmem:[%s3202_s16 + $0x38] sm:$0xff] %vm1994_vm3, %v1937_v40  ;;  %v1938_v42 = vadd.f32 %v3195_v25, %v1757_v41 }
 0x242   : > { %v1760_v43 = vpop.xlane.xlu1 %1759 }
 0x243   : > { %2003 = vst.msk [vmem:[%s3202_s16 + $0x40] sm:$0xff] %vm1994_vm3, %v1938_v42  ;;  %v1939_v44 = vadd.f32 %v3195_v25, %v1760_v43 }
 0x244   : > { %v1763_v45 = vpop.xlane.xlu0 %1762 }
 0x245   : > { %2004 = vst.msk [vmem:[%s3202_s16 + $0x48] sm:$0xff] %vm1994_vm3, %v1939_v44  ;;  %v1940_v46 = vadd.f32 %v3195_v25, %v1763_v45 }
 0x246   : > { %v1766_v47 = vpop.xlane.xlu1 %1765 }
 0x247   : > { %2005 = vst.msk [vmem:[%s3202_s16 + $0x50] sm:$0xff] %vm1994_vm3, %v1940_v46  ;;  %v1941_v48 = vadd.f32 %v3195_v25, %v1766_v47 }
 0x248   : > { %v1769_v49 = vpop.xlane.xlu0 %1768 }
 0x249   : > { %2006 = vst.msk [vmem:[%s3202_s16 + $0x58] sm:$0xff] %vm1994_vm3, %v1941_v48  ;;  %v1942_v50 = vadd.f32 %v3195_v25, %v1769_v49 }
 0x24a   : > { %v1772_v51 = vpop.xlane.xlu1 %1771 }
 0x24b   : > { %2007 = vst.msk [vmem:[%s3202_s16 + $0x60] sm:$0xff] %vm1994_vm3, %v1942_v50  ;;  %v1943_v52 = vadd.f32 %v3195_v25, %v1772_v51 }
 0x24c   : > { %v1775_v53 = vpop.xlane.xlu0 %1774 }
 0x24d   : > { %2008 = vst.msk [vmem:[%s3202_s16 + $0x68] sm:$0xff] %vm1994_vm3, %v1943_v52  ;;  %v1944_v54 = vadd.f32 %v3195_v25, %v1775_v53 }
 0x24e   : > { %v1778_v55 = vpop.xlane.xlu1 %1777 }
 0x24f   : > { %2009 = vst.msk [vmem:[%s3202_s16 + $0x70] sm:$0xff] %vm1994_vm3, %v1944_v54  ;;  %v1945_v56 = vadd.f32 %v3195_v25, %v1778_v55 }
 0x250   : > { %v1781_v57 = vpop.xlane.xlu0 %1780 }
 0x251   : > { %2010 = vst.msk [vmem:[%s3202_s16 + $0x78] sm:$0xff] %vm1994_vm3, %v1945_v56  ;;  %v1946_v58 = vadd.f32 %v3195_v25, %v1781_v57 }
 0x252   : > { %v1784_v59 = vpop.xlane.xlu1 %1783 }
 0x253   : > { %2011 = vst.msk [vmem:[%s3202_s16 + $0x80] sm:$0xff] %vm1994_vm3, %v1946_v58  ;;  %v1947_v60 = vadd.f32 %v3195_v25, %v1784_v59 }
 0x254   : > { %v1787_v61 = vpop.xlane.xlu0 %1786 }
 0x255   : > { %2012 = vst.msk [vmem:[%s3202_s16 + $0x88] sm:$0xff] %vm1994_vm3, %v1947_v60  ;;  %v1948_v62 = vadd.f32 %v3195_v25, %v1787_v61 }
 0x256   : > { %v1790_v63 = vpop.xlane.xlu1 %1789 }
 0x257   : > { %2013 = vst.msk [vmem:[%s3202_s16 + $0x90] sm:$0xff] %vm1994_vm3, %v1948_v62  ;;  %v1949_v0 = vadd.f32 %v3195_v25, %v1790_v63 }
 0x258   : > { %v1793_v1 = vpop.xlane.xlu0 %1792 }
 0x259   : > { %2014 = vst.msk [vmem:[%s3202_s16 + $0x98] sm:$0xff] %vm1994_vm3, %v1949_v0  ;;  %v1950_v2 = vadd.f32 %v3195_v25, %v1793_v1 }
 0x25a   : > { %v1796_v3 = vpop.xlane.xlu1 %1795 }
 0x25b   : > { %2015 = vst.msk [vmem:[%s3202_s16 + $0xa0] sm:$0xff] %vm1994_vm3, %v1950_v2  ;;  %v1951_v4 = vadd.f32 %v3195_v25, %v1796_v3 }
 0x25c   : > { %v1799_v5 = vpop.xlane.xlu0 %1798 }
 0x25d   : > { %2016 = vst.msk [vmem:[%s3202_s16 + $0xa8] sm:$0xff] %vm1994_vm3, %v1951_v4  ;;  %v1952_v6 = vadd.f32 %v3195_v25, %v1799_v5 }
 0x25e   : > { %v1802_v7 = vpop.xlane.xlu1 %1801 }
 0x25f   : > { %2017 = vst.msk [vmem:[%s3202_s16 + $0xb0] sm:$0xff] %vm1994_vm3, %v1952_v6  ;;  %v1953_v8 = vadd.f32 %v3195_v25, %v1802_v7 }
 0x260   : > { %v1805_v9 = vpop.xlane.xlu0 %1804 }
 0x261   : > { %2018 = vst.msk [vmem:[%s3202_s16 + $0xb8] sm:$0xff] %vm1994_vm3, %v1953_v8  ;;  %v1954_v10 = vadd.f32 %v3195_v25, %v1805_v9 }
 0x262   : > { %v1808_v12 = vpop.xlane.xlu1 %1807 }
 0x263   : > { %2019 = vst.msk [vmem:[%s3202_s16 + $0xc0] sm:$0xff] %vm1994_vm3, %v1954_v10  ;;  %v1955_v13 = vadd.f32 %v3195_v25, %v1808_v12 }
 0x264   : > { %v1811_v14 = vpop.xlane.xlu0 %1810 }
 0x265   : > { %2020 = vst.msk [vmem:[%s3202_s16 + $0xc8] sm:$0xff] %vm1994_vm3, %v1955_v13  ;;  %v1956_v16 = vadd.f32 %v3195_v25, %v1811_v14 }
 0x266   : > { %v1814_v17 = vpop.xlane.xlu1 %1813 }
 0x267   : > { %2021 = vst.msk [vmem:[%s3202_s16 + $0xd0] sm:$0xff] %vm1994_vm3, %v1956_v16  ;;  %v1957_v18 = vadd.f32 %v3195_v25, %v1814_v17 }
 0x268   : > { %v1817_v19 = vpop.xlane.xlu0 %1816 }
 0x269   : > { %2022 = vst.msk [vmem:[%s3202_s16 + $0xd8] sm:$0xff] %vm1994_vm3, %v1957_v18  ;;  %v1958_v20 = vadd.f32 %v3195_v25, %v1817_v19 }
 0x26a   : > { %v1820_v21 = vpop.xlane.xlu1 %1819 }
 0x26b   : > { %2023 = vst.msk [vmem:[%s3202_s16 + $0xe0] sm:$0xff] %vm1994_vm3, %v1958_v20  ;;  %v1959_v22 = vadd.f32 %v3195_v25, %v1820_v21 }
 0x26c   : > { %v1823_v23 = vpop.xlane.xlu0 %1822 }
 0x26d   : > { %2024 = vst.msk [vmem:[%s3202_s16 + $0xe8] sm:$0xff] %vm1994_vm3, %v1959_v22  ;;  %v1960_v24 = vadd.f32 %v3195_v25, %v1823_v23 }
 0x26e   : > { %v1826_v15 = vpop.xlane.xlu1 %1825 }
 0x26f   : > { %2025 = vst.msk [vmem:[%s3202_s16 + $0xf0] sm:$0xff] %vm1994_vm3, %v1960_v24  ;;  %v1961_v11 = vadd.f32 %v3195_v25, %v1826_v15 }
 0x270   : > { %v1829_v26 = vpop.xlane.xlu0 %1828 }
 0x271   : > { %2026 = vst.msk [vmem:[%s3202_s16 + $0xf8] sm:$0xff] %vm1994_vm3, %v1961_v11  ;;  %v1962_v27 = vadd.f32 %v3195_v25, %v1829_v26 }
 0x272   : > { %v1832_v28 = vpop.xlane.xlu1 %1831 }
 0x273   : > { %2027 = vst.msk [vmem:[%s3202_s16 + $0x100] sm:$0xff] %vm1994_vm3, %v1962_v27  ;;  %v1963_v29 = vadd.f32 %v3195_v25, %v1832_v28 }
 0x274   : > { %v1835_v30 = vpop.xlane.xlu0 %1834 }
 0x275   : > { %2028 = vst.msk [vmem:[%s3202_s16 + $0x108] sm:$0xff] %vm1994_vm3, %v1963_v29  ;;  %v1964_v31 = vadd.f32 %v3195_v25, %v1835_v30 }
 0x276   : > { %v1838_v32 = vpop.xlane.xlu1 %1837 }
 0x277   : > { %2029 = vst.msk [vmem:[%s3202_s16 + $0x110] sm:$0xff] %vm1994_vm3, %v1964_v31  ;;  %v1965_v33 = vadd.f32 %v3195_v25, %v1838_v32 }
 0x278   : > { %v1841_v34 = vpop.xlane.xlu0 %1840 }
 0x279   : > { %2030 = vst.msk [vmem:[%s3202_s16 + $0x118] sm:$0xff] %vm1994_vm3, %v1965_v33  ;;  %v1966_v35 = vadd.f32 %v3195_v25, %v1841_v34 }
 0x27a   : > { %v1844_v36 = vpop.xlane.xlu1 %1843 }
 0x27b   : > { %2031 = vst.msk [vmem:[%s3202_s16 + $0x120] sm:$0xff] %vm1994_vm3, %v1966_v35  ;;  %v1967_v37 = vadd.f32 %v3195_v25, %v1844_v36 }
 0x27c   : > { %v1847_v38 = vpop.xlane.xlu0 %1846 }
 0x27d   : > { %2032 = vst.msk [vmem:[%s3202_s16 + $0x128] sm:$0xff] %vm1994_vm3, %v1967_v37  ;;  %v1968_v39 = vadd.f32 %v3195_v25, %v1847_v38 }
 0x27e   : > { %v1850_v40 = vpop.xlane.xlu1 %1849 }
 0x27f   : > { %2033 = vst.msk [vmem:[%s3202_s16 + $0x130] sm:$0xff] %vm1994_vm3, %v1968_v39  ;;  %v1969_v41 = vadd.f32 %v3195_v25, %v1850_v40 }
 0x280   : > { %v1853_v42 = vpop.xlane.xlu0 %1852 }
 0x281   : > { %2034 = vst.msk [vmem:[%s3202_s16 + $0x138] sm:$0xff] %vm1994_vm3, %v1969_v41  ;;  %v1970_v43 = vadd.f32 %v3195_v25, %v1853_v42 }
 0x282   : > { %v1856_v44 = vpop.xlane.xlu1 %1855 }
 0x283   : > { %2035 = vst.msk [vmem:[%s3202_s16 + $0x140] sm:$0xff] %vm1994_vm3, %v1970_v43  ;;  %v1971_v45 = vadd.f32 %v3195_v25, %v1856_v44 }
 0x284   : > { %v1859_v46 = vpop.xlane.xlu0 %1858 }
 0x285   : > { %2036 = vst.msk [vmem:[%s3202_s16 + $0x148] sm:$0xff] %vm1994_vm3, %v1971_v45  ;;  %v1972_v47 = vadd.f32 %v3195_v25, %v1859_v46 }
 0x286   : > { %v1862_v48 = vpop.xlane.xlu1 %1861 }
 0x287   : > { %2037 = vst.msk [vmem:[%s3202_s16 + $0x150] sm:$0xff] %vm1994_vm3, %v1972_v47  ;;  %v1973_v49 = vadd.f32 %v3195_v25, %v1862_v48 }
 0x288   : > { %v1865_v50 = vpop.xlane.xlu0 %1864 }
 0x289   : > { %2038 = vst.msk [vmem:[%s3202_s16 + $0x158] sm:$0xff] %vm1994_vm3, %v1973_v49  ;;  %v1974_v51 = vadd.f32 %v3195_v25, %v1865_v50 }
 0x28a   : > { %v1868_v52 = vpop.xlane.xlu1 %1867 }
 0x28b   : > { %2039 = vst.msk [vmem:[%s3202_s16 + $0x160] sm:$0xff] %vm1994_vm3, %v1974_v51  ;;  %v1975_v53 = vadd.f32 %v3195_v25, %v1868_v52 }
 0x28c   : > { %v1871_v54 = vpop.xlane.xlu0 %1870 }
 0x28d   : > { %2040 = vst.msk [vmem:[%s3202_s16 + $0x168] sm:$0xff] %vm1994_vm3, %v1975_v53  ;;  %v1976_v55 = vadd.f32 %v3195_v25, %v1871_v54 }
 0x28e   : > { %v1874_v56 = vpop.xlane.xlu1 %1873 }
 0x28f   : > { %2041 = vst.msk [vmem:[%s3202_s16 + $0x170] sm:$0xff] %vm1994_vm3, %v1976_v55  ;;  %v1977_v57 = vadd.f32 %v3195_v25, %v1874_v56 }
 0x290   : > { %v1877_v58 = vpop.xlane.xlu0 %1876 }
 0x291   : > { %2042 = vst.msk [vmem:[%s3202_s16 + $0x178] sm:$0xff] %vm1994_vm3, %v1977_v57  ;;  %v1978_v59 = vadd.f32 %v3195_v25, %v1877_v58 }
 0x292   : > { %v1880_v60 = vpop.xlane.xlu1 %1879 }
 0x293   : > { %2043 = vst.msk [vmem:[%s3202_s16 + $0x180] sm:$0xff] %vm1994_vm3, %v1978_v59  ;;  %v1979_v61 = vadd.f32 %v3195_v25, %v1880_v60 }
 0x294   : > { %v1883_v62 = vpop.xlane.xlu0 %1882 }
 0x295   : > { %2044 = vst.msk [vmem:[%s3202_s16 + $0x188] sm:$0xff] %vm1994_vm3, %v1979_v61  ;;  %v1980_v63 = vadd.f32 %v3195_v25, %v1883_v62 }
 0x296   : > { %v1886_v0 = vpop.xlane.xlu1 %1885 }
 0x297   : > { %2045 = vst.msk [vmem:[%s3202_s16 + $0x190] sm:$0xff] %vm1994_vm3, %v1980_v63  ;;  %v1981_v1 = vadd.f32 %v3195_v25, %v1886_v0 }
 0x298   : > { %v1889_v2 = vpop.xlane.xlu0 %1888 }
 0x299   : > { %2046 = vst.msk [vmem:[%s3202_s16 + $0x198] sm:$0xff] %vm1994_vm3, %v1981_v1  ;;  %v1982_v3 = vadd.f32 %v3195_v25, %v1889_v2 }
 0x29a   : > { %v1892_v4 = vpop.xlane.xlu1 %1891 }
 0x29b   : > { %2047 = vst.msk [vmem:[%s3202_s16 + $0x1a0] sm:$0xff] %vm1994_vm3, %v1982_v3  ;;  %v1983_v5 = vadd.f32 %v3195_v25, %v1892_v4 }
 0x29c   : > { %v1895_v6 = vpop.xlane.xlu0 %1894 }
 0x29d   : > { %2048 = vst.msk [vmem:[%s3202_s16 + $0x1a8] sm:$0xff] %vm1994_vm3, %v1983_v5  ;;  %v1984_v7 = vadd.f32 %v3195_v25, %v1895_v6 }
 0x29e   : > { %v1898_v8 = vpop.xlane.xlu1 %1897 }
 0x29f   : > { %2049 = vst.msk [vmem:[%s3202_s16 + $0x1b0] sm:$0xff] %vm1994_vm3, %v1984_v7  ;;  %v1985_v9 = vadd.f32 %v3195_v25, %v1898_v8 }
 0x2a0   : > { %v1901_v10 = vpop.xlane.xlu0 %1900 }
 0x2a1   : > { %2050 = vst.msk [vmem:[%s3202_s16 + $0x1b8] sm:$0xff] %vm1994_vm3, %v1985_v9  ;;  %v1986_v12 = vadd.f32 %v3195_v25, %v1901_v10 }
 0x2a2   : > { %v1904_v13 = vpop.xlane.xlu1 %1903 }
 0x2a3   : > { %2051 = vst.msk [vmem:[%s3202_s16 + $0x1c0] sm:$0xff] %vm1994_vm3, %v1986_v12  ;;  %v1987_v14 = vadd.f32 %v3195_v25, %v1904_v13 }
 0x2a4   : > { %v1907_v16 = vpop.xlane.xlu0 %1906 }
 0x2a5   : > { %2052 = vst.msk [vmem:[%s3202_s16 + $0x1c8] sm:$0xff] %vm1994_vm3, %v1987_v14  ;;  %v1988_v17 = vadd.f32 %v3195_v25, %v1907_v16 }
 0x2a6   : > { %v1910_v18 = vpop.xlane.xlu1 %1909 }
 0x2a7   : > { %2053 = vst.msk [vmem:[%s3202_s16 + $0x1d0] sm:$0xff] %vm1994_vm3, %v1988_v17  ;;  %v1989_v19 = vadd.f32 %v3195_v25, %v1910_v18 }
 0x2a8   : > { %v1913_v20 = vpop.xlane.xlu0 %1912 }
 0x2a9   : > { %2054 = vst.msk [vmem:[%s3202_s16 + $0x1d8] sm:$0xff] %vm1994_vm3, %v1989_v19  ;;  %v1990_v21 = vadd.f32 %v3195_v25, %v1913_v20 }
 0x2aa   : > { %v1916_v22 = vpop.xlane.xlu1 %1915 }
 0x2ab   : > { %2055 = vst.msk [vmem:[%s3202_s16 + $0x1e0] sm:$0xff] %vm1994_vm3, %v1990_v21  ;;  %v1991_v23 = vadd.f32 %v3195_v25, %v1916_v22 }
 0x2ac   : > { %v1919_v24 = vpop.xlane.xlu0 %1918 }
 0x2ad   : > { %2056 = vst.msk [vmem:[%s3202_s16 + $0x1e8] sm:$0xff] %vm1994_vm3, %v1991_v23  ;;  %v1992_v15 = vadd.f32 %v3195_v25, %v1919_v24 }
 0x2ae   : > { %v1922_v11 = vpop.xlane.xlu1 %1921 }
 0x2af   : > { %2057 = vst.msk [vmem:[%s3202_s16 + $0x1f0] sm:$0xff] %vm1994_vm3, %v1992_v15  ;;  %v1993_v26 = vadd.f32 %v3195_v25, %v1922_v11 }
 0x2b1   : > { %2058 = vst.msk [vmem:[%s3202_s16 + $0x1f8] sm:$0xff] %vm1994_vm3, %v1993_v26 }
 0x2b2 PF: > { %s19_s26 = sadd.s32 1, %s2639_s26  }
 0x2b3   : > { %p16_p4 = scmp.ge.s32.totalorder %s19_s26, 4  }
 0x2b5   :  { %18 = sbr.rel (!%p16_p4) target bundleno = 3 (0x3), region = 78 }

</bundles_post_ra>
